<compile_context>
chip_gen: v6e
topology: v6e:2x2x1
jax: 0.10.0
libtpu: 0.0.40
codegen_flags: <defaults>
</compile_context>

<pallas_src>
import functools

import jax
import jax.numpy as jnp
import numpy as np
from jax.experimental import pallas as pl
from jax.experimental.pallas import tpu as pltpu


def _round_up(x, m):
    return (x + m - 1) // m * m


# --------------------------------------------------------------------------
# Fused kernel: conv3x3 + IN  ->  conv3x3 + IN + LeakyReLU(0.1), per batch elem
# --------------------------------------------------------------------------
def _up_fused_kernel(x_ref, mask_ref, w1_ref, w2_ref, o_ref, y1_scr,
                     *, Wp, L, off_x, off_y, inv_n):
    """Channels-major (C, flat padded spatial) fused decoder block.

    Conv taps = 9 shifted lane-slices of the bf16 source buffer fed straight
    into 9 accumulating MXU matmuls (f32 accumulator).  Conv bias is omitted on
    purpose: InstanceNorm (affine=False) cancels any per-channel constant.
    """
    mask = mask_ref[...]                       # (1, L) f32, 1 on the HxW interior

    def conv3x3(src_ref, w_ref, off):
        acc = None
        for k in range(9):
            ky, kx = divmod(k, 3)
            start = off + (ky - 1) * Wp + (kx - 1)       # static slice start
            part = jnp.dot(w_ref[k], src_ref[:, start:start + L],
                           preferred_element_type=jnp.float32)
            acc = part if acc is None else acc + part
        return acc

    def instance_norm(acc):
        # one-pass masked stats over the H*W interior (per channel)
        am = acc * mask
        s = jnp.sum(am, axis=1, keepdims=True)
        ss = jnp.sum(am * acc, axis=1, keepdims=True)
        mean = s * inv_n
        var = jnp.maximum(ss * inv_n - mean * mean, 0.0)
        return (acc - mean) * jax.lax.rsqrt(var + 1e-5)

    cm = y1_scr.shape[0]

    # --- stage 1: conv1 + InstanceNorm; result stays in VMEM (bf16) --------
    y1 = instance_norm(conv3x3(x_ref, w1_ref, off_x)) * mask
    # zero the halo of the y1 scratch (tiny), then one lane-aligned slab store.
    y1_scr[:, 0:off_y] = jnp.zeros((cm, off_y), y1_scr.dtype)
    y1_scr[:, off_y + L:] = jnp.zeros((cm, y1_scr.shape[1] - off_y - L),
                                      y1_scr.dtype)
    y1_scr[:, off_y:off_y + L] = y1.astype(y1_scr.dtype)

    # --- stage 2: conv2 + InstanceNorm + LeakyReLU(0.1) ---------------------
    y2 = instance_norm(conv3x3(y1_scr, w2_ref, off_y))
    o_ref[...] = jnp.where(y2 > 0, y2, 0.1 * y2).astype(o_ref.dtype)


# --------------------------------------------------------------------------
# Plain-JAX glue (channels-major / NCHW end-to-end: no transposes)
# --------------------------------------------------------------------------
def _interp_matrix(in_size, out_size):
    """Dense (out_size, in_size) bilinear interp matrix, align_corners=True."""
    if in_size == 1 or out_size == 1:
        m = np.zeros((out_size, in_size), np.float32)
        m[:, 0] = 1.0
        return jnp.asarray(m)
    src = np.arange(out_size, dtype=np.float64) * (in_size - 1) / (out_size - 1)
    i0 = np.clip(np.floor(src).astype(np.int64), 0, in_size - 1)
    i1 = np.minimum(i0 + 1, in_size - 1)
    f = src - i0
    m = np.zeros((out_size, in_size), np.float64)
    m[np.arange(out_size), i0] += 1.0 - f
    m[np.arange(out_size), i1] += f
    return jnp.asarray(m, dtype=jnp.float32)


def _bilinear_up2(x):
    """NCHW bilinear 2x upsample (align_corners=True) via two interp matmuls.

    Default precision (no HIGHEST multi-pass emulation); output feeds a bf16
    conv anyway."""
    _, _, h, w = x.shape
    mh = _interp_matrix(h, 2 * h)
    mw = _interp_matrix(w, 2 * w)
    y = jnp.einsum('nchw,Hh->ncHw', x, mh)
    return jnp.einsum('ncHw,Ww->ncHW', y, mw)


def _fold_weights(w, cin_pad, cout_pad):
    """OIHW (Cout, Cin, 3, 3) -> (9, cout_pad, cin_pad) bf16, k = ky*3 + kx."""
    cout, cin = w.shape[0], w.shape[1]
    wp = jnp.pad(w, ((0, cout_pad - cout), (0, cin_pad - cin), (0, 0), (0, 0)))
    wt = jnp.transpose(wp, (2, 3, 0, 1))                # (ky, kx, Cout, Cin)
    return wt.reshape(9, cout_pad, cin_pad).astype(jnp.bfloat16)


def up_forward(x1, x2, params):
    """Pallas implementation.  x1: [N, C1, H/2, W/2], x2: [N, C2, H, W] (NCHW)."""
    w1, _b1, w2, _b2 = params   # biases cancel exactly under InstanceNorm
    N, c2, H, W = x2.shape
    c1 = x1.shape[1]
    c_in = c1 + c2
    c_out = w1.shape[0]

    # upsample + pad + channel concat; cast to bf16 *before* the pad chain so
    # every later HBM pass (and the kernel DMA) moves half the bytes.
    x1u = _bilinear_up2(x1)
    dY, dX = H - x1u.shape[2], W - x1u.shape[3]
    x1u = jnp.pad(x1u, ((0, 0), (0, 0),
                        (dY // 2, dY - dY // 2), (dX // 2, dX - dX // 2)))
    x = jnp.concatenate([x2.astype(jnp.bfloat16), x1u.astype(jnp.bfloat16)],
                        axis=1)                          # (N, c_in, H, W) bf16

    ci8 = _round_up(c_in, 8)
    cm8 = _round_up(c_out, 8)      # conv1 out == conv2 in == conv2 out
    Wp = W + 2                     # conv-grid row stride (no 8x round-up)
    Hc = H + 2                     # conv-grid rows (image + 1 border each side)
    L = Hc * Wp                    # conv-grid flat size
    # x buffer: 3 padded rows above/below the image => >= Wp+1 halo elements on
    # each side of the conv grid after flattening, so every one of the 9 tap
    # slices is a static in-bounds slice.  Channel pad + conv border + halo all
    # come from one jnp.pad.
    Hb = H + 6
    Lb = Hb * Wp
    off_x = 2 * Wp                       # conv-grid start inside the x buffer
    off_y = _round_up(Wp + 1, 128)       # 128-aligned conv-grid start in y1 scratch
    L_ext_y = off_y + L + (Wp + 1)

    xb = jnp.pad(x, ((0, 0), (0, ci8 - c_in), (3, 3), (1, 1)))
    x_flat = xb.reshape(N, ci8, Lb)      # contiguous collapse -> view, no copy

    w1f = _fold_weights(w1, ci8, cm8)
    w2f = _fold_weights(w2, cm8, cm8)

    # interior mask (1 over the original HxW image) as a constant input;
    # constant index_map -> fetched once.
    m = np.zeros((Hc, Wp), np.float32)
    m[1:H + 1, 1:W + 1] = 1.0
    mask = jnp.asarray(m.reshape(1, L))

    # explicit scoped-VMEM budget from actual block + scratch sizes (+headroom)
    need = (2 * ci8 * Lb * 2            # x block, double-buffered, bf16
            + 2 * cm8 * L * 4           # output block, double-buffered, f32
            + 2 * L * 4                 # mask
            + 2 * 9 * (cm8 * ci8 + cm8 * cm8) * 2   # weights
            + cm8 * L_ext_y * 2)        # y1 scratch, bf16
    vmem_limit = int(min(max(2 * need, 16 * 2**20), 64 * 2**20))

    kernel = functools.partial(_up_fused_kernel, Wp=Wp, L=L, off_x=off_x,
                               off_y=off_y, inv_n=1.0 / float(H * W))
    out = pl.pallas_call(
        kernel,
        out_shape=jax.ShapeDtypeStruct((N, cm8, L), jnp.float32),
        grid=(N,),
        in_specs=[
            pl.BlockSpec((None, ci8, Lb), lambda n: (n, 0, 0)),
            pl.BlockSpec((1, L), lambda n: (0, 0)),
            pl.BlockSpec((9, cm8, ci8), lambda n: (0, 0, 0)),
            pl.BlockSpec((9, cm8, cm8), lambda n: (0, 0, 0)),
        ],
        out_specs=pl.BlockSpec((None, cm8, L), lambda n: (n, 0, 0)),
        scratch_shapes=[pltpu.VMEM((cm8, L_ext_y), jnp.bfloat16)],
        compiler_params=pltpu.CompilerParams(
            dimension_semantics=("parallel",),
            vmem_limit_bytes=vmem_limit),
    )(x_flat, mask, w1f, w2f)

    # un-flatten, drop border padding and channel padding
    return out.reshape(N, cm8, Hc, Wp)[:, :c_out, 1:H + 1, 1:W + 1]


# --------------------------------------------------------------------------
# Pure-JAX reference mirroring the PyTorch forward (for verification)
# --------------------------------------------------------------------------
def up_reference(x1, x2, params):
    w1, b1, w2, b2 = params

    def bilinear(x):
        _, _, H, W = x.shape
        oh, ow = 2 * H, 2 * W

        def coords(n_in, n_out):
            src = (jnp.arange(n_out, dtype=jnp.float32)
                   * (n_in - 1) / max(n_out - 1, 1))
            i0 = jnp.clip(jnp.floor(src).astype(jnp.int32), 0, n_in - 1)
            i1 = jnp.clip(i0 + 1, 0, n_in - 1)
            return i0, i1, src - i0.astype(jnp.float32)

        y0, y1_, fy = coords(H, oh)
        x0, x1_, fx = coords(W, ow)
        rows = (x[:, :, y0, :] * (1 - fy)[None, None, :, None]
                + x[:, :, y1_, :] * fy[None, None, :, None])
        return (rows[:, :, :, x0] * (1 - fx)[None, None, None, :]
                + rows[:, :, :, x1_] * fx[None, None, None, :])

    x1u = bilinear(x1)
    dY = x2.shape[2] - x1u.shape[2]
    dX = x2.shape[3] - x1u.shape[3]
    x1u = jnp.pad(x1u, ((0, 0), (0, 0),
                        (dY // 2, dY - dY // 2), (dX // 2, dX - dX // 2)))
    x = jnp.concatenate([x2, x1u], axis=1)

    def conv(x, w, b):
        y = jax.lax.conv_general_dilated(
            x, w, (1, 1), ((1, 1), (1, 1)),
            dimension_numbers=('NCHW', 'OIHW', 'NCHW'),
            precision=jax.lax.Precision.HIGHEST)
        return y + b[None, :, None, None]

    def inorm(y):
        m = jnp.mean(y, axis=(2, 3), keepdims=True)
        v = jnp.mean((y - m) ** 2, axis=(2, 3), keepdims=True)
        return (y - m) * jax.lax.rsqrt(v + 1e-5)

    y1 = inorm(conv(x, w1, b1))
    y2 = inorm(conv(y1, w2, b2))
    return jnp.where(y2 > 0, y2, 0.1 * y2)


if __name__ == "__main__":
    in_ch, out_ch = 8, 4
    N, H, W = 2, 16, 16

    key = jax.random.PRNGKey(0)
    k1, k2, k3, k4, k5, k6 = jax.random.split(key, 6)
    w1 = 0.1 * jax.random.normal(k1, (out_ch, in_ch, 3, 3), jnp.float32)
    b1 = 0.1 * jax.random.normal(k2, (out_ch,), jnp.float32)
    w2 = 0.1 * jax.random.normal(k3, (out_ch, out_ch, 3, 3), jnp.float32)
    b2 = 0.1 * jax.random.normal(k4, (out_ch,), jnp.float32)
    params = (w1, b1, w2, b2)

    x1 = jax.random.normal(k5, (N, in_ch // 2, H // 2, W // 2), jnp.float32)
    x2 = jax.random.normal(k6, (N, in_ch // 2, H, W), jnp.float32)

    out = jax.block_until_ready(jax.jit(up_forward)(x1, x2, params))
    ref = up_reference(x1, x2, params)

    assert out.shape == (N, out_ch, H, W), out.shape
    # bf16 staging / bf16 MXU operands (f32 accumulate) -> relaxed tolerance vs
    # the HIGHEST-precision f32 reference.
    if not np.allclose(np.asarray(out), np.asarray(ref), rtol=3e-2, atol=3e-2):
        raise AssertionError("Pallas kernel output mismatch vs reference")
    print("KERNEL_OK")
</pallas_src>

<mosaic_0001>
module attributes {stable_mosaic.version = 11 : i64} {
  func.func @_up_fused_kernel(%arg0: i32, %arg1: memref<1x8x396xbf16, #tpu.memory_space<vmem>>, %arg2: memref<1x324xf32, #tpu.memory_space<vmem>>, %arg3: memref<9x8x8xbf16, #tpu.memory_space<vmem>>, %arg4: memref<9x8x8xbf16, #tpu.memory_space<vmem>>, %arg5: memref<1x8x324xf32, #tpu.memory_space<vmem>>, %arg6: memref<8x471xbf16, #tpu.memory_space<vmem>>) attributes {dimension_semantics = [#tpu.dimension_semantics<parallel>], iteration_bounds = array<i64: 2>, scalar_prefetch = 0 : i64, scratch_operands = 1 : i64, tpu.core_type = #tpu.core_type<tc>, window_params = [{transform_indices = @transform_0, window_bounds = array<i64: 1, 8, 396>}, {pipeline_mode = #tpu.pipeline_mode<synchronous>, transform_indices = @transform_1, window_bounds = array<i64: 1, 324>}, {pipeline_mode = #tpu.pipeline_mode<synchronous>, transform_indices = @transform_2, window_bounds = array<i64: 9, 8, 8>}, {pipeline_mode = #tpu.pipeline_mode<synchronous>, transform_indices = @transform_3, window_bounds = array<i64: 9, 8, 8>}, {transform_indices = @transform_4, window_bounds = array<i64: 1, 8, 324>}]} {
    %c0 = arith.constant 0 : index
    %c0_0 = arith.constant 0 : index
    %0 = vector.load %arg2[%c0, %c0_0] : memref<1x324xf32, #tpu.memory_space<vmem>>, vector<1x324xf32>
    %c0_1 = arith.constant 0 : index
    %c0_2 = arith.constant 0 : index
    %c0_3 = arith.constant 0 : index
    %1 = vector.load %arg3[%c0_1, %c0_2, %c0_3] : memref<9x8x8xbf16, #tpu.memory_space<vmem>>, vector<1x8x8xbf16>
    %2 = vector.shape_cast %1 : vector<1x8x8xbf16> to vector<8x8xbf16>
    %c0_4 = arith.constant 0 : index
    %c0_5 = arith.constant 0 : index
    %c17 = arith.constant 17 : index
    %3 = vector.load %arg1[%c0_4, %c0_5, %c17] : memref<1x8x396xbf16, #tpu.memory_space<vmem>>, vector<1x8x324xbf16>
    %4 = vector.shape_cast %3 : vector<1x8x324xbf16> to vector<8x324xbf16>
    %cst = arith.constant dense<0.000000e+00> : vector<8x324xf32>
    %5 = tpu.matmul %2, %4, %cst {dimension_numbers = #tpu.dot_dimension_numbers<[1], [0], [0], [1], [0, 0, 1, 1], [], []>} : vector<8x8xbf16>, vector<8x324xbf16>, vector<8x324xf32> -> vector<8x324xf32>
    %c1 = arith.constant 1 : index
    %c0_6 = arith.constant 0 : index
    %c0_7 = arith.constant 0 : index
    %6 = vector.load %arg3[%c1, %c0_6, %c0_7] : memref<9x8x8xbf16, #tpu.memory_space<vmem>>, vector<1x8x8xbf16>
    %7 = vector.shape_cast %6 : vector<1x8x8xbf16> to vector<8x8xbf16>
    %c0_8 = arith.constant 0 : index
    %c0_9 = arith.constant 0 : index
    %c18 = arith.constant 18 : index
    %8 = vector.load %arg1[%c0_8, %c0_9, %c18] : memref<1x8x396xbf16, #tpu.memory_space<vmem>>, vector<1x8x324xbf16>
    %9 = vector.shape_cast %8 : vector<1x8x324xbf16> to vector<8x324xbf16>
    %cst_10 = arith.constant dense<0.000000e+00> : vector<8x324xf32>
    %10 = tpu.matmul %7, %9, %cst_10 {dimension_numbers = #tpu.dot_dimension_numbers<[1], [0], [0], [1], [0, 0, 1, 1], [], []>} : vector<8x8xbf16>, vector<8x324xbf16>, vector<8x324xf32> -> vector<8x324xf32>
    %11 = arith.addf %5, %10 : vector<8x324xf32>
    %c2 = arith.constant 2 : index
    %c0_11 = arith.constant 0 : index
    %c0_12 = arith.constant 0 : index
    %12 = vector.load %arg3[%c2, %c0_11, %c0_12] : memref<9x8x8xbf16, #tpu.memory_space<vmem>>, vector<1x8x8xbf16>
    %13 = vector.shape_cast %12 : vector<1x8x8xbf16> to vector<8x8xbf16>
    %c0_13 = arith.constant 0 : index
    %c0_14 = arith.constant 0 : index
    %c19 = arith.constant 19 : index
    %14 = vector.load %arg1[%c0_13, %c0_14, %c19] : memref<1x8x396xbf16, #tpu.memory_space<vmem>>, vector<1x8x324xbf16>
    %15 = vector.shape_cast %14 : vector<1x8x324xbf16> to vector<8x324xbf16>
    %cst_15 = arith.constant dense<0.000000e+00> : vector<8x324xf32>
    %16 = tpu.matmul %13, %15, %cst_15 {dimension_numbers = #tpu.dot_dimension_numbers<[1], [0], [0], [1], [0, 0, 1, 1], [], []>} : vector<8x8xbf16>, vector<8x324xbf16>, vector<8x324xf32> -> vector<8x324xf32>
    %17 = arith.addf %11, %16 : vector<8x324xf32>
    %c3 = arith.constant 3 : index
    %c0_16 = arith.constant 0 : index
    %c0_17 = arith.constant 0 : index
    %18 = vector.load %arg3[%c3, %c0_16, %c0_17] : memref<9x8x8xbf16, #tpu.memory_space<vmem>>, vector<1x8x8xbf16>
    %19 = vector.shape_cast %18 : vector<1x8x8xbf16> to vector<8x8xbf16>
    %c0_18 = arith.constant 0 : index
    %c0_19 = arith.constant 0 : index
    %c35 = arith.constant 35 : index
    %20 = vector.load %arg1[%c0_18, %c0_19, %c35] : memref<1x8x396xbf16, #tpu.memory_space<vmem>>, vector<1x8x324xbf16>
    %21 = vector.shape_cast %20 : vector<1x8x324xbf16> to vector<8x324xbf16>
    %cst_20 = arith.constant dense<0.000000e+00> : vector<8x324xf32>
    %22 = tpu.matmul %19, %21, %cst_20 {dimension_numbers = #tpu.dot_dimension_numbers<[1], [0], [0], [1], [0, 0, 1, 1], [], []>} : vector<8x8xbf16>, vector<8x324xbf16>, vector<8x324xf32> -> vector<8x324xf32>
    %23 = arith.addf %17, %22 : vector<8x324xf32>
    %c4 = arith.constant 4 : index
    %c0_21 = arith.constant 0 : index
    %c0_22 = arith.constant 0 : index
    %24 = vector.load %arg3[%c4, %c0_21, %c0_22] : memref<9x8x8xbf16, #tpu.memory_space<vmem>>, vector<1x8x8xbf16>
    %25 = vector.shape_cast %24 : vector<1x8x8xbf16> to vector<8x8xbf16>
    %c0_23 = arith.constant 0 : index
    %c0_24 = arith.constant 0 : index
    %c36 = arith.constant 36 : index
    %26 = vector.load %arg1[%c0_23, %c0_24, %c36] : memref<1x8x396xbf16, #tpu.memory_space<vmem>>, vector<1x8x324xbf16>
    %27 = vector.shape_cast %26 : vector<1x8x324xbf16> to vector<8x324xbf16>
    %cst_25 = arith.constant dense<0.000000e+00> : vector<8x324xf32>
    %28 = tpu.matmul %25, %27, %cst_25 {dimension_numbers = #tpu.dot_dimension_numbers<[1], [0], [0], [1], [0, 0, 1, 1], [], []>} : vector<8x8xbf16>, vector<8x324xbf16>, vector<8x324xf32> -> vector<8x324xf32>
    %29 = arith.addf %23, %28 : vector<8x324xf32>
    %c5 = arith.constant 5 : index
    %c0_26 = arith.constant 0 : index
    %c0_27 = arith.constant 0 : index
    %30 = vector.load %arg3[%c5, %c0_26, %c0_27] : memref<9x8x8xbf16, #tpu.memory_space<vmem>>, vector<1x8x8xbf16>
    %31 = vector.shape_cast %30 : vector<1x8x8xbf16> to vector<8x8xbf16>
    %c0_28 = arith.constant 0 : index
    %c0_29 = arith.constant 0 : index
    %c37 = arith.constant 37 : index
    %32 = vector.load %arg1[%c0_28, %c0_29, %c37] : memref<1x8x396xbf16, #tpu.memory_space<vmem>>, vector<1x8x324xbf16>
    %33 = vector.shape_cast %32 : vector<1x8x324xbf16> to vector<8x324xbf16>
    %cst_30 = arith.constant dense<0.000000e+00> : vector<8x324xf32>
    %34 = tpu.matmul %31, %33, %cst_30 {dimension_numbers = #tpu.dot_dimension_numbers<[1], [0], [0], [1], [0, 0, 1, 1], [], []>} : vector<8x8xbf16>, vector<8x324xbf16>, vector<8x324xf32> -> vector<8x324xf32>
    %35 = arith.addf %29, %34 : vector<8x324xf32>
    %c6 = arith.constant 6 : index
    %c0_31 = arith.constant 0 : index
    %c0_32 = arith.constant 0 : index
    %36 = vector.load %arg3[%c6, %c0_31, %c0_32] : memref<9x8x8xbf16, #tpu.memory_space<vmem>>, vector<1x8x8xbf16>
    %37 = vector.shape_cast %36 : vector<1x8x8xbf16> to vector<8x8xbf16>
    %c0_33 = arith.constant 0 : index
    %c0_34 = arith.constant 0 : index
    %c53 = arith.constant 53 : index
    %38 = vector.load %arg1[%c0_33, %c0_34, %c53] : memref<1x8x396xbf16, #tpu.memory_space<vmem>>, vector<1x8x324xbf16>
    %39 = vector.shape_cast %38 : vector<1x8x324xbf16> to vector<8x324xbf16>
    %cst_35 = arith.constant dense<0.000000e+00> : vector<8x324xf32>
    %40 = tpu.matmul %37, %39, %cst_35 {dimension_numbers = #tpu.dot_dimension_numbers<[1], [0], [0], [1], [0, 0, 1, 1], [], []>} : vector<8x8xbf16>, vector<8x324xbf16>, vector<8x324xf32> -> vector<8x324xf32>
    %41 = arith.addf %35, %40 : vector<8x324xf32>
    %c7 = arith.constant 7 : index
    %c0_36 = arith.constant 0 : index
    %c0_37 = arith.constant 0 : index
    %42 = vector.load %arg3[%c7, %c0_36, %c0_37] : memref<9x8x8xbf16, #tpu.memory_space<vmem>>, vector<1x8x8xbf16>
    %43 = vector.shape_cast %42 : vector<1x8x8xbf16> to vector<8x8xbf16>
    %c0_38 = arith.constant 0 : index
    %c0_39 = arith.constant 0 : index
    %c54 = arith.constant 54 : index
    %44 = vector.load %arg1[%c0_38, %c0_39, %c54] : memref<1x8x396xbf16, #tpu.memory_space<vmem>>, vector<1x8x324xbf16>
    %45 = vector.shape_cast %44 : vector<1x8x324xbf16> to vector<8x324xbf16>
    %cst_40 = arith.constant dense<0.000000e+00> : vector<8x324xf32>
    %46 = tpu.matmul %43, %45, %cst_40 {dimension_numbers = #tpu.dot_dimension_numbers<[1], [0], [0], [1], [0, 0, 1, 1], [], []>} : vector<8x8xbf16>, vector<8x324xbf16>, vector<8x324xf32> -> vector<8x324xf32>
    %47 = arith.addf %41, %46 : vector<8x324xf32>
    %c8 = arith.constant 8 : index
    %c0_41 = arith.constant 0 : index
    %c0_42 = arith.constant 0 : index
    %48 = vector.load %arg3[%c8, %c0_41, %c0_42] : memref<9x8x8xbf16, #tpu.memory_space<vmem>>, vector<1x8x8xbf16>
    %49 = vector.shape_cast %48 : vector<1x8x8xbf16> to vector<8x8xbf16>
    %c0_43 = arith.constant 0 : index
    %c0_44 = arith.constant 0 : index
    %c55 = arith.constant 55 : index
    %50 = vector.load %arg1[%c0_43, %c0_44, %c55] : memref<1x8x396xbf16, #tpu.memory_space<vmem>>, vector<1x8x324xbf16>
    %51 = vector.shape_cast %50 : vector<1x8x324xbf16> to vector<8x324xbf16>
    %cst_45 = arith.constant dense<0.000000e+00> : vector<8x324xf32>
    %52 = tpu.matmul %49, %51, %cst_45 {dimension_numbers = #tpu.dot_dimension_numbers<[1], [0], [0], [1], [0, 0, 1, 1], [], []>} : vector<8x8xbf16>, vector<8x324xbf16>, vector<8x324xf32> -> vector<8x324xf32>
    %53 = arith.addf %47, %52 : vector<8x324xf32>
    %54 = vector.broadcast %0 : vector<1x324xf32> to vector<8x324xf32>
    %55 = arith.mulf %53, %54 : vector<8x324xf32>
    %cst_46 = arith.constant dense<0.000000e+00> : vector<8xf32>
    %56 = vector.multi_reduction <add>, %55, %cst_46 [1] : vector<8x324xf32> to vector<8xf32>
    %57 = vector.shape_cast %56 : vector<8xf32> to vector<8x1xf32>
    %58 = arith.mulf %55, %53 : vector<8x324xf32>
    %cst_47 = arith.constant dense<0.000000e+00> : vector<8xf32>
    %59 = vector.multi_reduction <add>, %58, %cst_47 [1] : vector<8x324xf32> to vector<8xf32>
    %60 = vector.shape_cast %59 : vector<8xf32> to vector<8x1xf32>
    %cst_48 = arith.constant 3.906250e-03 : f32
    %61 = vector.broadcast %cst_48 : f32 to vector<8x1xf32>
    %62 = arith.mulf %57, %61 : vector<8x1xf32>
    %cst_49 = arith.constant 3.906250e-03 : f32
    %63 = vector.broadcast %cst_49 : f32 to vector<8x1xf32>
    %64 = arith.mulf %60, %63 : vector<8x1xf32>
    %65 = arith.mulf %62, %62 : vector<8x1xf32>
    %66 = arith.subf %64, %65 : vector<8x1xf32>
    %cst_50 = arith.constant 0.000000e+00 : f32
    %67 = vector.broadcast %cst_50 : f32 to vector<8x1xf32>
    %68 = arith.maximumf %66, %67 : vector<8x1xf32>
    %69 = vector.broadcast %62 : vector<8x1xf32> to vector<8x324xf32>
    %70 = arith.subf %53, %69 : vector<8x324xf32>
    %cst_51 = arith.constant 9.99999974E-6 : f32
    %71 = vector.broadcast %cst_51 : f32 to vector<8x1xf32>
    %72 = arith.addf %68, %71 : vector<8x1xf32>
    %73 = math.rsqrt %72 : vector<8x1xf32>
    %74 = vector.broadcast %73 : vector<8x1xf32> to vector<8x324xf32>
    %75 = arith.mulf %70, %74 : vector<8x324xf32>
    %76 = vector.broadcast %0 : vector<1x324xf32> to vector<8x324xf32>
    %77 = arith.mulf %75, %76 : vector<8x324xf32>
    %cst_52 = arith.constant 0.000000e+00 : bf16
    %78 = vector.broadcast %cst_52 : bf16 to vector<8x128xbf16>
    %c0_53 = arith.constant 0 : index
    %c0_54 = arith.constant 0 : index
    %79 = vector.load %arg6[%c0_53, %c0_54] : memref<8x471xbf16, #tpu.memory_space<vmem>>, vector<8x128xbf16>
    tpu.vector_store %arg6[%c0_53, %c0_54], %78 {strides = array<i32>} : memref<8x471xbf16, #tpu.memory_space<vmem>>, vector<8x128xbf16>,
    %cst_55 = arith.constant 0.000000e+00 : bf16
    %80 = vector.broadcast %cst_55 : bf16 to vector<8x19xbf16>
    %c0_56 = arith.constant 0 : index
    %c452 = arith.constant 452 : index
    %81 = vector.load %arg6[%c0_56, %c452] : memref<8x471xbf16, #tpu.memory_space<vmem>>, vector<8x19xbf16>
    tpu.vector_store %arg6[%c0_56, %c452], %80 {strides = array<i32>} : memref<8x471xbf16, #tpu.memory_space<vmem>>, vector<8x19xbf16>,
    %82 = arith.truncf %77 : vector<8x324xf32> to vector<8x324xbf16>
    %c0_57 = arith.constant 0 : index
    %c128 = arith.constant 128 : index
    %83 = vector.load %arg6[%c0_57, %c128] : memref<8x471xbf16, #tpu.memory_space<vmem>>, vector<8x324xbf16>
    tpu.vector_store %arg6[%c0_57, %c128], %82 {strides = array<i32>} : memref<8x471xbf16, #tpu.memory_space<vmem>>, vector<8x324xbf16>,
    %c0_58 = arith.constant 0 : index
    %c0_59 = arith.constant 0 : index
    %c0_60 = arith.constant 0 : index
    %84 = vector.load %arg4[%c0_58, %c0_59, %c0_60] : memref<9x8x8xbf16, #tpu.memory_space<vmem>>, vector<1x8x8xbf16>
    %85 = vector.shape_cast %84 : vector<1x8x8xbf16> to vector<8x8xbf16>
    %c0_61 = arith.constant 0 : index
    %c109 = arith.constant 109 : index
    %86 = vector.load %arg6[%c0_61, %c109] : memref<8x471xbf16, #tpu.memory_space<vmem>>, vector<8x324xbf16>
    %cst_62 = arith.constant dense<0.000000e+00> : vector<8x324xf32>
    %87 = tpu.matmul %85, %86, %cst_62 {dimension_numbers = #tpu.dot_dimension_numbers<[1], [0], [0], [1], [0, 0, 1, 1], [], []>} : vector<8x8xbf16>, vector<8x324xbf16>, vector<8x324xf32> -> vector<8x324xf32>
    %c1_63 = arith.constant 1 : index
    %c0_64 = arith.constant 0 : index
    %c0_65 = arith.constant 0 : index
    %88 = vector.load %arg4[%c1_63, %c0_64, %c0_65] : memref<9x8x8xbf16, #tpu.memory_space<vmem>>, vector<1x8x8xbf16>
    %89 = vector.shape_cast %88 : vector<1x8x8xbf16> to vector<8x8xbf16>
    %c0_66 = arith.constant 0 : index
    %c110 = arith.constant 110 : index
    %90 = vector.load %arg6[%c0_66, %c110] : memref<8x471xbf16, #tpu.memory_space<vmem>>, vector<8x324xbf16>
    %cst_67 = arith.constant dense<0.000000e+00> : vector<8x324xf32>
    %91 = tpu.matmul %89, %90, %cst_67 {dimension_numbers = #tpu.dot_dimension_numbers<[1], [0], [0], [1], [0, 0, 1, 1], [], []>} : vector<8x8xbf16>, vector<8x324xbf16>, vector<8x324xf32> -> vector<8x324xf32>
    %92 = arith.addf %87, %91 : vector<8x324xf32>
    %c2_68 = arith.constant 2 : index
    %c0_69 = arith.constant 0 : index
    %c0_70 = arith.constant 0 : index
    %93 = vector.load %arg4[%c2_68, %c0_69, %c0_70] : memref<9x8x8xbf16, #tpu.memory_space<vmem>>, vector<1x8x8xbf16>
    %94 = vector.shape_cast %93 : vector<1x8x8xbf16> to vector<8x8xbf16>
    %c0_71 = arith.constant 0 : index
    %c111 = arith.constant 111 : index
    %95 = vector.load %arg6[%c0_71, %c111] : memref<8x471xbf16, #tpu.memory_space<vmem>>, vector<8x324xbf16>
    %cst_72 = arith.constant dense<0.000000e+00> : vector<8x324xf32>
    %96 = tpu.matmul %94, %95, %cst_72 {dimension_numbers = #tpu.dot_dimension_numbers<[1], [0], [0], [1], [0, 0, 1, 1], [], []>} : vector<8x8xbf16>, vector<8x324xbf16>, vector<8x324xf32> -> vector<8x324xf32>
    %97 = arith.addf %92, %96 : vector<8x324xf32>
    %c3_73 = arith.constant 3 : index
    %c0_74 = arith.constant 0 : index
    %c0_75 = arith.constant 0 : index
    %98 = vector.load %arg4[%c3_73, %c0_74, %c0_75] : memref<9x8x8xbf16, #tpu.memory_space<vmem>>, vector<1x8x8xbf16>
    %99 = vector.shape_cast %98 : vector<1x8x8xbf16> to vector<8x8xbf16>
    %c0_76 = arith.constant 0 : index
    %c127 = arith.constant 127 : index
    %100 = vector.load %arg6[%c0_76, %c127] : memref<8x471xbf16, #tpu.memory_space<vmem>>, vector<8x324xbf16>
    %cst_77 = arith.constant dense<0.000000e+00> : vector<8x324xf32>
    %101 = tpu.matmul %99, %100, %cst_77 {dimension_numbers = #tpu.dot_dimension_numbers<[1], [0], [0], [1], [0, 0, 1, 1], [], []>} : vector<8x8xbf16>, vector<8x324xbf16>, vector<8x324xf32> -> vector<8x324xf32>
    %102 = arith.addf %97, %101 : vector<8x324xf32>
    %c4_78 = arith.constant 4 : index
    %c0_79 = arith.constant 0 : index
    %c0_80 = arith.constant 0 : index
    %103 = vector.load %arg4[%c4_78, %c0_79, %c0_80] : memref<9x8x8xbf16, #tpu.memory_space<vmem>>, vector<1x8x8xbf16>
    %104 = vector.shape_cast %103 : vector<1x8x8xbf16> to vector<8x8xbf16>
    %c0_81 = arith.constant 0 : index
    %c128_82 = arith.constant 128 : index
    %105 = vector.load %arg6[%c0_81, %c128_82] : memref<8x471xbf16, #tpu.memory_space<vmem>>, vector<8x324xbf16>
    %cst_83 = arith.constant dense<0.000000e+00> : vector<8x324xf32>
    %106 = tpu.matmul %104, %105, %cst_83 {dimension_numbers = #tpu.dot_dimension_numbers<[1], [0], [0], [1], [0, 0, 1, 1], [], []>} : vector<8x8xbf16>, vector<8x324xbf16>, vector<8x324xf32> -> vector<8x324xf32>
    %107 = arith.addf %102, %106 : vector<8x324xf32>
    %c5_84 = arith.constant 5 : index
    %c0_85 = arith.constant 0 : index
    %c0_86 = arith.constant 0 : index
    %108 = vector.load %arg4[%c5_84, %c0_85, %c0_86] : memref<9x8x8xbf16, #tpu.memory_space<vmem>>, vector<1x8x8xbf16>
    %109 = vector.shape_cast %108 : vector<1x8x8xbf16> to vector<8x8xbf16>
    %c0_87 = arith.constant 0 : index
    %c129 = arith.constant 129 : index
    %110 = vector.load %arg6[%c0_87, %c129] : memref<8x471xbf16, #tpu.memory_space<vmem>>, vector<8x324xbf16>
    %cst_88 = arith.constant dense<0.000000e+00> : vector<8x324xf32>
    %111 = tpu.matmul %109, %110, %cst_88 {dimension_numbers = #tpu.dot_dimension_numbers<[1], [0], [0], [1], [0, 0, 1, 1], [], []>} : vector<8x8xbf16>, vector<8x324xbf16>, vector<8x324xf32> -> vector<8x324xf32>
    %112 = arith.addf %107, %111 : vector<8x324xf32>
    %c6_89 = arith.constant 6 : index
    %c0_90 = arith.constant 0 : index
    %c0_91 = arith.constant 0 : index
    %113 = vector.load %arg4[%c6_89, %c0_90, %c0_91] : memref<9x8x8xbf16, #tpu.memory_space<vmem>>, vector<1x8x8xbf16>
    %114 = vector.shape_cast %113 : vector<1x8x8xbf16> to vector<8x8xbf16>
    %c0_92 = arith.constant 0 : index
    %c145 = arith.constant 145 : index
    %115 = vector.load %arg6[%c0_92, %c145] : memref<8x471xbf16, #tpu.memory_space<vmem>>, vector<8x324xbf16>
    %cst_93 = arith.constant dense<0.000000e+00> : vector<8x324xf32>
    %116 = tpu.matmul %114, %115, %cst_93 {dimension_numbers = #tpu.dot_dimension_numbers<[1], [0], [0], [1], [0, 0, 1, 1], [], []>} : vector<8x8xbf16>, vector<8x324xbf16>, vector<8x324xf32> -> vector<8x324xf32>
    %117 = arith.addf %112, %116 : vector<8x324xf32>
    %c7_94 = arith.constant 7 : index
    %c0_95 = arith.constant 0 : index
    %c0_96 = arith.constant 0 : index
    %118 = vector.load %arg4[%c7_94, %c0_95, %c0_96] : memref<9x8x8xbf16, #tpu.memory_space<vmem>>, vector<1x8x8xbf16>
    %119 = vector.shape_cast %118 : vector<1x8x8xbf16> to vector<8x8xbf16>
    %c0_97 = arith.constant 0 : index
    %c146 = arith.constant 146 : index
    %120 = vector.load %arg6[%c0_97, %c146] : memref<8x471xbf16, #tpu.memory_space<vmem>>, vector<8x324xbf16>
    %cst_98 = arith.constant dense<0.000000e+00> : vector<8x324xf32>
    %121 = tpu.matmul %119, %120, %cst_98 {dimension_numbers = #tpu.dot_dimension_numbers<[1], [0], [0], [1], [0, 0, 1, 1], [], []>} : vector<8x8xbf16>, vector<8x324xbf16>, vector<8x324xf32> -> vector<8x324xf32>
    %122 = arith.addf %117, %121 : vector<8x324xf32>
    %c8_99 = arith.constant 8 : index
    %c0_100 = arith.constant 0 : index
    %c0_101 = arith.constant 0 : index
    %123 = vector.load %arg4[%c8_99, %c0_100, %c0_101] : memref<9x8x8xbf16, #tpu.memory_space<vmem>>, vector<1x8x8xbf16>
    %124 = vector.shape_cast %123 : vector<1x8x8xbf16> to vector<8x8xbf16>
    %c0_102 = arith.constant 0 : index
    %c147 = arith.constant 147 : index
    %125 = vector.load %arg6[%c0_102, %c147] : memref<8x471xbf16, #tpu.memory_space<vmem>>, vector<8x324xbf16>
    %cst_103 = arith.constant dense<0.000000e+00> : vector<8x324xf32>
    %126 = tpu.matmul %124, %125, %cst_103 {dimension_numbers = #tpu.dot_dimension_numbers<[1], [0], [0], [1], [0, 0, 1, 1], [], []>} : vector<8x8xbf16>, vector<8x324xbf16>, vector<8x324xf32> -> vector<8x324xf32>
    %127 = arith.addf %122, %126 : vector<8x324xf32>
    %128 = vector.broadcast %0 : vector<1x324xf32> to vector<8x324xf32>
    %129 = arith.mulf %127, %128 : vector<8x324xf32>
    %cst_104 = arith.constant dense<0.000000e+00> : vector<8xf32>
    %130 = vector.multi_reduction <add>, %129, %cst_104 [1] : vector<8x324xf32> to vector<8xf32>
    %131 = vector.shape_cast %130 : vector<8xf32> to vector<8x1xf32>
    %132 = arith.mulf %129, %127 : vector<8x324xf32>
    %cst_105 = arith.constant dense<0.000000e+00> : vector<8xf32>
    %133 = vector.multi_reduction <add>, %132, %cst_105 [1] : vector<8x324xf32> to vector<8xf32>
    %134 = vector.shape_cast %133 : vector<8xf32> to vector<8x1xf32>
    %cst_106 = arith.constant 3.906250e-03 : f32
    %135 = vector.broadcast %cst_106 : f32 to vector<8x1xf32>
    %136 = arith.mulf %131, %135 : vector<8x1xf32>
    %cst_107 = arith.constant 3.906250e-03 : f32
    %137 = vector.broadcast %cst_107 : f32 to vector<8x1xf32>
    %138 = arith.mulf %134, %137 : vector<8x1xf32>
    %139 = arith.mulf %136, %136 : vector<8x1xf32>
    %140 = arith.subf %138, %139 : vector<8x1xf32>
    %cst_108 = arith.constant 0.000000e+00 : f32
    %141 = vector.broadcast %cst_108 : f32 to vector<8x1xf32>
    %142 = arith.maximumf %140, %141 : vector<8x1xf32>
    %143 = vector.broadcast %136 : vector<8x1xf32> to vector<8x324xf32>
    %144 = arith.subf %127, %143 : vector<8x324xf32>
    %cst_109 = arith.constant 9.99999974E-6 : f32
    %145 = vector.broadcast %cst_109 : f32 to vector<8x1xf32>
    %146 = arith.addf %142, %145 : vector<8x1xf32>
    %147 = math.rsqrt %146 : vector<8x1xf32>
    %148 = vector.broadcast %147 : vector<8x1xf32> to vector<8x324xf32>
    %149 = arith.mulf %144, %148 : vector<8x324xf32>
    %cst_110 = arith.constant 0.000000e+00 : f32
    %150 = vector.broadcast %cst_110 : f32 to vector<8x324xf32>
    %151 = arith.cmpf ogt, %149, %150 : vector<8x324xf32>
    %cst_111 = arith.constant 1.000000e-01 : f32
    %152 = vector.broadcast %cst_111 : f32 to vector<8x324xf32>
    %153 = arith.mulf %152, %149 : vector<8x324xf32>
    %154 = arith.select %151, %149, %153 : vector<8x324xi1>, vector<8x324xf32>
    %c0_112 = arith.constant 0 : index
    %c0_113 = arith.constant 0 : index
    %c0_114 = arith.constant 0 : index
    %155 = vector.load %arg5[%c0_112, %c0_113, %c0_114] : memref<1x8x324xf32, #tpu.memory_space<vmem>>, vector<1x8x324xf32>
    %156 = vector.shape_cast %155 : vector<1x8x324xf32> to vector<8x324xf32>
    %157 = vector.shape_cast %154 : vector<8x324xf32> to vector<1x8x324xf32>
    tpu.vector_store %arg5[%c0_112, %c0_113, %c0_114], %157 {strides = array<i32>} : memref<1x8x324xf32, #tpu.memory_space<vmem>>, vector<1x8x324xf32>,
    return
  }
  func.func @transform_0(%arg0: i32) -> (i32, i32, i32) {
    %c0_i32 = arith.constant 0 : i32
    %c0_i32_0 = arith.constant 0 : i32
    %c0_i32_1 = arith.constant 0 : i32
    return %arg0, %c0_i32, %c0_i32_0 : i32, i32, i32
  }
  func.func @transform_1(%arg0: i32) -> (i32, i32) {
    %c0_i32 = arith.constant 0 : i32
    %c0_i32_0 = arith.constant 0 : i32
    %c0_i32_1 = arith.constant 0 : i32
    return %c0_i32, %c0_i32_0 : i32, i32
  }
  func.func @transform_2(%arg0: i32) -> (i32, i32, i32) {
    %c0_i32 = arith.constant 0 : i32
    %c0_i32_0 = arith.constant 0 : i32
    %c0_i32_1 = arith.constant 0 : i32
    %c0_i32_2 = arith.constant 0 : i32
    return %c0_i32, %c0_i32_0, %c0_i32_1 : i32, i32, i32
  }
  func.func @transform_3(%arg0: i32) -> (i32, i32, i32) {
    %c0_i32 = arith.constant 0 : i32
    %c0_i32_0 = arith.constant 0 : i32
    %c0_i32_1 = arith.constant 0 : i32
    %c0_i32_2 = arith.constant 0 : i32
    return %c0_i32, %c0_i32_0, %c0_i32_1 : i32, i32, i32
  }
  func.func @transform_4(%arg0: i32) -> (i32, i32, i32) {
    %c0_i32 = arith.constant 0 : i32
    %c0_i32_0 = arith.constant 0 : i32
    %c0_i32_1 = arith.constant 0 : i32
    return %arg0, %c0_i32, %c0_i32_0 : i32, i32, i32
  }
}

</mosaic_0001>

<bundles_post_ra>
// kernel: up_forward.1
= control target key start
LH: loop header
LB: loop body
LE: loop exit
PB: predicated region body
PF: predicated region fallthrough
CT: control target
= control target key end

     0   :  { %s2639_s15 = smov 0   ;;  %s2954_s0 = inlined_call_operand.vmem [shape: bf16[2,8,396], index: 0, kind: input, shape index: {}]   ;;  %s2955_s1 = inlined_call_operand.vmem [shape: f32[1,324], index: 1, kind: input, shape index: {}]   ;;  %s2956_s2 = inlined_call_operand.vmem [shape: bf16[9,8,8], index: 2, kind: input, shape index: {}]   ;;  %s2957_s3 = inlined_call_operand.vmem [shape: bf16[9,8,8], index: 3, kind: input, shape index: {}]   ;;  %s2958_s4 = inlined_call_operand.vmem [shape: f32[2,8,324], index: 4, kind: output, shape index: {}]  }
   0x1 LB: > { %s2310_s16 = sadd.s32 4294967295, %s2595_s15   ;;  %p2314_p0 = scmp.ge.s32.totalorder %s2595_s15, 1  ;;  %s2595_s15 = sphi %s2639_s15, %s14_s15  }
   0x2   : > { %p162_p1 = scmp.lt.s32.totalorder %s2595_s15, 3 }
   0x4   : > { %p163_p2 = pnand %p2314_p0, %p162_p1 }
   0x5   : > { %p188_p3 = scmp.lt.s32.totalorder (!%p163_p2), %s2310_s16, 1  ;;  %s2600_s21 = smov (!%p163_p2), 110  }
   0x6   : > { %166 = sbr.rel (%p163_p2) target bundleno = 1146 (0x47a), region = 36  ;;  %s2601_s22 = smov (!%p163_p2), 111  }
   0x7   : > { %s2602_s23 = smov (!%p163_p2), 109   ;;  %s2603_s24 = smov (!%p163_p2), 93  }
   0x8   : > { %s2604_s25 = smov (!%p163_p2), 92   ;;  %s2605_s26 = smov (!%p163_p2), 91  }
   0x9   : > { %s2606_s27 = smov (!%p163_p2), 75   ;;  %s2607_s28 = smov (!%p163_p2), 74  }
   0xa   : > { %s2608_s29 = smov (!%p163_p2), 73   ;;  %s2610_s30 = smov (!%p163_p2), 19  }
   0xb   : > { %v2597_v0 = vmov 0.0   ;;  %vm2598_vm0 = vmmov 0   ;;  %s2960_s16 = smov (!%p188_p3, %s2310_s16), 1  ;;  %v2599_v1 = vmov 0   ;;  %vm226_vm1 = vcmask 1043456   ;;  %s2611_s5 = smov 17  }
   0xc   : > { %2441 = vmatprep.subr.bf16.mxu1 %v2597_v0  ;;  %2443 = vmatprep.mubr.msk.bf16.mxu1 %vm2598_vm0, %v2597_v0  ;;  %s2402_s17 = sshll.u32 %s2960_s16, 4  ;;  %1217 = vst [vmem:[#allocation2] sm:$0xf] %v2599_v1  ;;  %v2318_v9 = vld [vmem:[%s2956_s2 + $0x4] sm:$0xf]  ;;  %vm222_vm2 = vcmask 64512  }
   0xd   : > { %268 = vmatprep.mubr.bf16.mxu0 %v2599_v1  ;;  %s192_s20 = scalar_lea.vmem %s2954_s0, %s2402_s17  ;;  %vm219_vm3 = vcmask 900096   ;;  %vm323_vm4 = vcmask 908288   ;;  %v200_v20 = vld [vmem:[%s2956_s2] sm:$0xf]  ;;  %vm427_vm5 = vcmask 891904   ;;  %vm534_vm6 = vcmask 760832  }
   0xe   : > { %v2575_v2 = vld [vmem:[%s192_s20 + $0x8] ss:$0 sps:$4 sm:$0xff]   ;;  %v201_v3 = vld [vmem:[%s192_s20] sm:$0xff]  ;;  %vm641_vm7 = vcmask 752640   ;;  %v2332_v39 = vld [vmem:[%s2956_s2 + $0xc] sm:$0xf] }
   0xf   : > { %v2319_v4 = vcombine.low %v201_v3, %v201_v3  ;;  %217 = vrot.lane.b32.xlu1 %v2575_v2, %s2600_s21  ;;  %v2320_v5 = vcombine.high %v201_v3, %v201_v3  ;;  %v2328_v30 = vld [vmem:[%s2956_s2 + $0x8] sm:$0xf]  ;;  %vm748_vm8 = vcmask 744448   ;;  %v2336_v49 = vld [vmem:[%s2956_s2 + $0x10] sm:$0xf]  ;;  %vm855_vm9 = vcmask 613376  }
  0x10   : > { %v2340_v58 = vld [vmem:[%s2956_s2 + $0x14] sm:$0xf]  ;;  %vm962_vm10 = vcmask 605184   ;;  %vm1069_vm11 = vcmask 596992   ;;  %vm1188_vm12 = vcmask 556032   ;;  %vm1218_vm13 = vcmask 708128  }
  0x11   : > { %213 = vrot.lane.b32.xlu0 %v2319_v4, %s2600_s21  ;;  %1219 = vst.msk [vmem:[#allocation2 + $0xc] sm:$0xf] %vm1218_vm13, %v2599_v1  ;;  %vm1234_vm14 = vcmask 551936   ;;  %s2612_s6 = smov 1   ;;  %s2613_s7 = smov 127   ;;  %vm1259_vm15 = vcmask 146432  }
  0x13   : > { %317 = vrot.lane.b32.xlu1 %v2319_v4, %s2601_s22 }
  0x15   : > { %215 = vrot.lane.b32.xlu0 %v2320_v5, %s2600_s21 }
  0x17   : > { %321 = vrot.lane.b32.xlu1 %v2575_v2, %s2601_s22 }
  0x19   : > { %319 = vrot.lane.b32.xlu0 %v2320_v5, %s2601_s22 }
  0x1b   : > { %423 = vrot.lane.b32.xlu1 %v2320_v5, %s2602_s23 }
  0x1d   : > { %421 = vrot.lane.b32.xlu0 %v2319_v4, %s2602_s23 }
  0x1f   : > { %528 = vrot.lane.b32.xlu1 %v2319_v4, %s2603_s24 }
  0x21   : > { %425 = vrot.lane.b32.xlu0 %v2575_v2, %s2602_s23 }
  0x23   : > { %532 = vrot.lane.b32.xlu1 %v2575_v2, %s2603_s24 }
  0x25   : > { %530 = vrot.lane.b32.xlu0 %v2320_v5, %s2603_s24 }
  0x27   : > { %637 = vrot.lane.b32.xlu1 %v2320_v5, %s2604_s25 }
  0x29   : > { %635 = vrot.lane.b32.xlu0 %v2319_v4, %s2604_s25 }
  0x2b   : > { %742 = vrot.lane.b32.xlu1 %v2319_v4, %s2605_s26 }
  0x2d   : > { %639 = vrot.lane.b32.xlu0 %v2575_v2, %s2604_s25 }
  0x2f   : > { %746 = vrot.lane.b32.xlu1 %v2575_v2, %s2605_s26 }
  0x31   : > { %744 = vrot.lane.b32.xlu0 %v2320_v5, %s2605_s26 }
  0x33   : > { %851 = vrot.lane.b32.xlu1 %v2320_v5, %s2606_s27 }
  0x35   : > { %849 = vrot.lane.b32.xlu0 %v2319_v4, %s2606_s27 }
  0x37   : > { %956 = vrot.lane.b32.xlu1 %v2319_v4, %s2607_s28 }
  0x39   : > { %853 = vrot.lane.b32.xlu0 %v2575_v2, %s2606_s27 }
  0x3b   : > { %960 = vrot.lane.b32.xlu1 %v2575_v2, %s2607_s28 }
  0x3d   : > { %958 = vrot.lane.b32.xlu0 %v2320_v5, %s2607_s28  ;;  %s2549_s28 = smul.u32 24, %s2960_s16 }
  0x3f   : > { %1065 = vrot.lane.b32.xlu1 %v2320_v5, %s2608_s29 }
  0x41   : > { %1063 = vrot.lane.b32.xlu0 %v2319_v4, %s2608_s29  ;;  %v2344_v4 = vld [vmem:[%s2956_s2 + $0x18] sm:$0xf] }
  0x45   : > { %1067 = vrot.lane.b32.xlu0 %v2575_v2, %s2608_s29  ;;  %s2609_s29 = smov 18  }
  0x81   : > { %v218_v6 = vpop.permute.xlu1 %217 }
  0x82   : > { %v234_v8 = vsel %vm226_vm1, %v218_v6, 0 }
  0x83   : > { %v214_v7 = vpop.permute.xlu0 %213  ;;  %2442 = vmatpush3.bf16.msra.mxu1 %v234_v8 }
  0x84   : > { %2447 = vmatprep.subr.bf16.mxu1 %v2597_v0 }
  0x85   : > { %v318_v10 = vpop.permute.xlu1 %317 }
  0x86   : > { %2444 = vmatmul.mubr.msk.bf16.vlgmr.msra.gmra.mxu1 %vm222_vm2, %v2318_v9 }
  0x87   : > { %v216_v11 = vpop.permute.xlu0 %215  ;;  %2449 = vmatprep.mubr.msk.bf16.mxu1 %vm2598_vm0, %v2597_v0 }
  0x88   : > { %v221_v12 = vsel %vm219_vm3, %v216_v11, %v218_v6  ;;  %v220_v13 = vsel %vm219_vm3, %v214_v7, %v216_v11  ;;  %v2348_v11 = vld [vmem:[%s2956_s2 + $0x1c] sm:$0xf] }
  0x89   : > { %2322 = vmatprep.subr.msk.bf16.mxu0 %vm226_vm1, %v221_v12  ;;  %v228_v14 = vsel %vm226_vm1, %v220_v13, 0  ;;  %v322_v15 = vpop.permute.xlu1 %321 }
  0x8a   : > { %251 = vmatpush1.bf16.msra.mxu0 %v228_v14  ;;  %v336_v16 = vsel %vm226_vm1, %v322_v15, 0 }
  0x8b   : > { %v320_v17 = vpop.permute.xlu0 %319  ;;  %2448 = vmatpush3.bf16.msra.mxu1 %v336_v16 }
  0x8c   : > { %v324_v18 = vsel %vm323_vm4, %v318_v10, %v320_v17  ;;  %v325_v19 = vsel %vm323_vm4, %v320_v17, %v322_v15  ;;  %2453 = vmatprep.subr.bf16.mxu1 %v2597_v0  ;;  %v2352_v15 = vld [vmem:[%s2956_s2 + $0x20] sm:$0xf] }
  0x8d   : > { %v330_v21 = vsel %vm226_vm1, %v324_v18, 0  ;;  %2323 = vmatmul.mubr.msk.bf16.vlgmr.msra.gmra.mxu0 %vm222_vm2, %v2318_v9  ;;  %2325 = vmatprep.subr.msk.bf16.mxu0 %vm226_vm1, %v325_v19  ;;  %v424_v22 = vpop.permute.xlu1 %423 }
  0x8e   : > { %353 = vmatpush1.bf16.msra.mxu0 %v330_v21  ;;  %370 = vmatprep.mubr.bf16.mxu0 %v2599_v1 }
  0x8f   : > { %v422_v23 = vpop.permute.xlu0 %421  ;;  %2450 = vmatmul.mubr.msk.bf16.vlgmr.msra.gmra.mxu1 %vm222_vm2, %v200_v20 }
  0x90   : > { %v428_v24 = vsel %vm427_vm5, %v422_v23, %v424_v22  ;;  %2455 = vmatprep.mubr.msk.bf16.mxu1 %vm2598_vm0, %v2597_v0 }
  0x91   : > { %v529_v25 = vpop.permute.xlu1 %528  ;;  %v434_v26 = vsel %vm226_vm1, %v428_v24, 0 }
  0x93   : > { %v426_v27 = vpop.permute.xlu0 %425 }
  0x94   : > { %v429_v28 = vsel %vm427_vm5, %v424_v22, %v426_v27  ;;  %v440_v29 = vsel %vm226_vm1, %v426_v27, 0 }
  0x95   : > { %2326 = vmatmul.mubr.msk.bf16.vlgmr.msra.gmra.mxu0 %vm222_vm2, %v200_v20  ;;  %2329 = vmatprep.subr.msk.bf16.mxu0 %vm226_vm1, %v429_v28  ;;  %v533_v31 = vpop.permute.xlu1 %532 }
  0x96   : > { %2454 = vmatpush3.bf16.msra.mxu1 %v440_v29  ;;  %457 = vmatpush1.bf16.msra.mxu0 %v434_v26  ;;  %v547_v32 = vsel %vm226_vm1, %v533_v31, 0 }
  0x97   : > { %v531_v33 = vpop.permute.xlu0 %530  ;;  %474 = vmatprep.mubr.bf16.mxu0 %v2599_v1  ;;  %2459 = vmatprep.subr.bf16.mxu1 %v2597_v0 }
  0x98   : > { %v535_v34 = vsel %vm534_vm6, %v529_v25, %v531_v33  ;;  %v536_v35 = vsel %vm534_vm6, %v531_v33, %v533_v31  ;;  %vm1364_vm6 = vcmask 154624  }
  0x99   : > { %2456 = vmatmul.mubr.msk.bf16.vlgmr.msra.gmra.mxu1 %vm222_vm2, %v2328_v30  ;;  %2333 = vmatprep.subr.msk.bf16.mxu0 %vm226_vm1, %v536_v35  ;;  %v638_v36 = vpop.permute.xlu1 %637  ;;  %v541_v37 = vsel %vm226_vm1, %v535_v34, 0 }
  0x9a   : > { %2460 = vmatpush3.bf16.msra.mxu1 %v547_v32  ;;  %2461 = vmatprep.mubr.msk.bf16.mxu1 %vm2598_vm0, %v2597_v0 }
  0x9b   : > { %v636_v38 = vpop.permute.xlu0 %635  ;;  %2465 = vmatprep.subr.bf16.mxu1 %v2597_v0 }
  0x9c   : > { %v642_v42 = vsel %vm641_vm7, %v636_v38, %v638_v36 }
  0x9d   : > { %2330 = vmatmul.mubr.msk.bf16.vlgmr.msra.gmra.mxu0 %vm222_vm2, %v2328_v30  ;;  %v743_v40 = vpop.permute.xlu1 %742  ;;  %v648_v46 = vsel %vm226_vm1, %v642_v42, 0 }
  0x9e   : > { %564 = vmatpush1.bf16.msra.mxu0 %v541_v37  ;;  %581 = vmatprep.mubr.bf16.mxu0 %v2599_v1 }
  0x9f   : > { %v640_v41 = vpop.permute.xlu0 %639 }
  0xa0   : > { %v643_v43 = vsel %vm641_vm7, %v638_v36, %v640_v41  ;;  %v654_v44 = vsel %vm226_vm1, %v640_v41, 0  ;;  %vm1471_vm7 = vcmask 138240  }
  0xa1   : > { %2462 = vmatmul.mubr.msk.bf16.vlgmr.msra.gmra.mxu1 %vm222_vm2, %v2332_v39  ;;  %2337 = vmatprep.subr.msk.bf16.mxu0 %vm226_vm1, %v643_v43  ;;  %v747_v45 = vpop.permute.xlu1 %746 }
  0xa2   : > { %2466 = vmatpush3.bf16.msra.mxu1 %v654_v44  ;;  %2467 = vmatprep.mubr.msk.bf16.mxu1 %vm2598_vm0, %v2597_v0  ;;  %v761_v51 = vsel %vm226_vm1, %v747_v45, 0 }
  0xa3   : > { %v745_v47 = vpop.permute.xlu0 %744  ;;  %2471 = vmatprep.subr.bf16.mxu1 %v2597_v0 }
  0xa4   : > { %v750_v48 = vsel %vm748_vm8, %v745_v47, %v747_v45  ;;  %v749_v53 = vsel %vm748_vm8, %v743_v40, %v745_v47  ;;  %vm1581_vm8 = vcmask 7168  }
  0xa5   : > { %2334 = vmatmul.mubr.msk.bf16.vlgmr.msra.gmra.mxu0 %vm222_vm2, %v2332_v39  ;;  %v852_v50 = vpop.permute.xlu1 %851  ;;  %v755_v54 = vsel %vm226_vm1, %v749_v53, 0 }
  0xa6   : > { %671 = vmatpush1.bf16.msra.mxu0 %v648_v46  ;;  %688 = vmatprep.mubr.bf16.mxu0 %v2599_v1 }
  0xa7   : > { %2341 = vmatprep.subr.msk.bf16.mxu0 %vm226_vm1, %v750_v48  ;;  %v850_v52 = vpop.permute.xlu0 %849 }
  0xa8   : > { %v856_v61 = vsel %vm855_vm9, %v850_v52, %v852_v50 }
  0xa9   : > { %2468 = vmatmul.mubr.msk.bf16.vlgmr.msra.gmra.mxu1 %vm222_vm2, %v2336_v49  ;;  %v957_v56 = vpop.permute.xlu1 %956  ;;  %v862_v63 = vsel %vm226_vm1, %v856_v61, 0 }
  0xaa   : > { %2472 = vmatpush3.bf16.msra.mxu1 %v761_v51  ;;  %2473 = vmatprep.mubr.msk.bf16.mxu1 %vm2598_vm0, %v2597_v0 }
  0xab   : > { %v854_v55 = vpop.permute.xlu0 %853  ;;  %2477 = vmatprep.subr.bf16.mxu1 %v2597_v0 }
  0xac   : > { %v857_v57 = vsel %vm855_vm9, %v852_v50, %v854_v55  ;;  %v868_v59 = vsel %vm226_vm1, %v854_v55, 0  ;;  %vm1797_vm9 = vcmask 1039360  }
  0xad   : > { %2338 = vmatmul.mubr.msk.bf16.vlgmr.msra.gmra.mxu0 %vm222_vm2, %v2336_v49  ;;  %v961_v62 = vpop.permute.xlu1 %960 }
  0xae   : > { %778 = vmatpush1.bf16.msra.mxu0 %v755_v54  ;;  %795 = vmatprep.mubr.bf16.mxu0 %v2599_v1  ;;  %v975_v5 = vsel %vm226_vm1, %v961_v62, 0 }
  0xaf   : > { %2345 = vmatprep.subr.msk.bf16.mxu0 %vm226_vm1, %v857_v57  ;;  %v959_v60 = vpop.permute.xlu0 %958 }
  0xb0   : > { %v964_v3 = vsel %vm962_vm10, %v959_v60, %v961_v62  ;;  %v963_v6 = vsel %vm962_vm10, %v957_v56, %v959_v60 }
  0xb1   : > { %2474 = vmatmul.mubr.msk.bf16.vlgmr.msra.gmra.mxu1 %vm222_vm2, %v2340_v58  ;;  %v1066_v7 = vpop.permute.xlu1 %1065  ;;  %v969_v9 = vsel %vm226_vm1, %v963_v6, 0 }
  0xb2   : > { %2478 = vmatpush3.bf16.msra.mxu1 %v868_v59  ;;  %2479 = vmatprep.mubr.msk.bf16.mxu1 %vm2598_vm0, %v2597_v0 }
  0xb3   : > { %2483 = vmatprep.subr.bf16.mxu1 %v2597_v0  ;;  %v1064_v2 = vpop.permute.xlu0 %1063 }
  0xb4   : > { %v1070_v13 = vsel %vm1069_vm11, %v1064_v2, %v1066_v7 }
  0xb5   : > { %2342 = vmatmul.mubr.msk.bf16.vlgmr.msra.gmra.mxu0 %vm222_vm2, %v2340_v58  ;;  %v1076_v14 = vsel %vm226_vm1, %v1070_v13, 0 }
  0xb6   : > { %885 = vmatpush1.bf16.msra.mxu0 %v862_v63  ;;  %902 = vmatprep.mubr.bf16.mxu0 %v2599_v1 }
  0xb7   : > { %2349 = vmatprep.subr.msk.bf16.mxu0 %vm226_vm1, %v964_v3  ;;  %v1068_v8 = vpop.permute.xlu0 %1067 }
  0xb8   : > { %v1071_v10 = vsel %vm1069_vm11, %v1066_v7, %v1068_v8  ;;  %v1082_v12 = vsel %vm226_vm1, %v1068_v8, 0 }
  0xb9   : > { %2480 = vmatmul.mubr.msk.bf16.vlgmr.msra.gmra.mxu1 %vm222_vm2, %v2344_v4 }
  0xba   : > { %2484 = vmatpush3.bf16.msra.mxu1 %v975_v5  ;;  %2485 = vmatprep.mubr.msk.bf16.mxu1 %vm2598_vm0, %v2597_v0 }
  0xbb   : > { %2489 = vmatprep.subr.bf16.mxu1 %v2597_v0 }
  0xbd   : > { %2346 = vmatmul.mubr.msk.bf16.vlgmr.msra.gmra.mxu0 %vm222_vm2, %v2344_v4 }
  0xbe   : > { %992 = vmatpush1.bf16.msra.mxu0 %v969_v9  ;;  %1009 = vmatprep.mubr.bf16.mxu0 %v2599_v1 }
  0xbf   : > { %2353 = vmatprep.subr.msk.bf16.mxu0 %vm226_vm1, %v1071_v10  ;;  %v1169_v10 = vlaneseq }
  0xc1   : > { %2486 = vmatmul.mubr.msk.bf16.vlgmr.msra.gmra.mxu1 %vm222_vm2, %v2348_v11 }
  0xc2   : > { %2490 = vmatpush3.bf16.msra.mxu1 %v1082_v12  ;;  %2491 = vmatprep.mubr.msk.bf16.mxu1 %vm2598_vm0, %v2597_v0 }
  0xc3   : > { %2495 = vmatprep.subr.bf16.mxu1 %v2597_v0 }
  0xc5   : > { %2350 = vmatmul.mubr.msk.bf16.vlgmr.msra.gmra.mxu0 %vm222_vm2, %v2348_v11 }
  0xc6   : > { %1099 = vmatpush1.bf16.msra.mxu0 %v1076_v14  ;;  %1116 = vmatprep.mubr.bf16.mxu0 %v2599_v1 }
  0xc9   : > { %2492 = vmatmul.mubr.msk.bf16.vlgmr.msra.gmra.mxu1 %vm222_vm2, %v2352_v15 }
  0xca   : > { %2497 = vmatprep.mubr.msk.bf16.mxu1 %vm2598_vm0, %v2597_v0 }
  0xcd   : > { %2354 = vmatmul.mubr.msk.bf16.vlgmr.msra.gmra.mxu0 %vm222_vm2, %v2352_v15 }
  0xce   : > { %1307 = vmatprep.mubr.bf16.mxu0 %v2599_v1 }
 0x146   : > { %v311_v16 = vpop.f32.mrf.mxu1 }
 0x148   : > { %v2445_v17 = vpop.f32.mrf.mxu1 }
 0x14a   : > { %v314_v18 = vpop.f32.mrf.mxu1 }
 0x14c   : > { %v2446_v20 = vpop.f32.mrf.mxu1 }
 0x14d   : > { %v270_v19 = vpop.f32.mrf.mxu0 }
 0x14f   : > { %v272_v21 = vpop.f32.mrf.mxu0  ;;  %v413_v22 = vpop.f32.mrf.mxu1 }
 0x150   : > { %v414_v4 = vadd.f32 %v413_v22, %v311_v16 }
 0x151   : > { %v274_v23 = vpop.f32.mrf.mxu0  ;;  %v2451_v24 = vpop.f32.mrf.mxu1 }
 0x152   : > { %v1170_v24 = vshrl.u32 %v1169_v10, 7 }
 0x153   : > { %v275_v25 = vpop.f32.mrf.mxu0  ;;  %v416_v26 = vpop.f32.mrf.mxu1 }
 0x155   : > { %v372_v27 = vpop.f32.mrf.mxu0  ;;  %v2452_v28 = vpop.f32.mrf.mxu1 }
 0x156   : > { %v373_v11 = vadd.f32 %v372_v27, %v270_v19  ;;  %v1179_v19 = vsub.s32 2, %v1170_v24 }
 0x157   : > { %v374_v29 = vpop.f32.mrf.mxu0 }
 0x158   : > { %v375_v15 = vadd.f32 %v374_v29, %v272_v21  ;;  %v199_v21 = vld [vmem:[%s2955_s1] sm:$0x7]  ;;  %v1171_v29 = vsub.s32 0, %v1170_v24 }
 0x159   : > { %v517_v30 = vpop.f32.mrf.mxu1  ;;  %v376_v31 = vpop.f32.mrf.mxu0 }
 0x15a   : > { %v525_v7 = vadd.f32 %v517_v30, %v414_v4 }
 0x15b   : > { %v2457_v32 = vpop.f32.mrf.mxu1  ;;  %v377_v33 = vpop.f32.mrf.mxu0 }
 0x15d   : > { %v520_v34 = vpop.f32.mrf.mxu1  ;;  %v476_v35 = vpop.f32.mrf.mxu0 }
 0x15e   : > { %v523_v17 = vadd.f32 %v476_v35, %v373_v11 }
 0x15f   : > { %v2458_v36 = vpop.f32.mrf.mxu1  ;;  %v478_v37 = vpop.f32.mrf.mxu0 }
 0x160   : > { %v524_v25 = vadd.f32 %v478_v37, %v375_v15 }
 0x161   : > { %v624_v38 = vpop.f32.mrf.mxu1  ;;  %v480_v39 = vpop.f32.mrf.mxu0 }
 0x162   : > { %v632_v12 = vadd.f32 %v624_v38, %v525_v7 }
 0x163   : > { %v2463_v40 = vpop.f32.mrf.mxu1  ;;  %v481_v41 = vpop.f32.mrf.mxu0 }
 0x164   : > { %v1175_v41 = vsub.s32 1, %v1170_v24 }
 0x165   : > { %v627_v42 = vpop.f32.mrf.mxu1  ;;  %v583_v43 = vpop.f32.mrf.mxu0 }
 0x166   : > { %v630_v26 = vadd.f32 %v583_v43, %v523_v17 }
 0x167   : > { %v2464_v44 = vpop.f32.mrf.mxu1  ;;  %v585_v45 = vpop.f32.mrf.mxu0 }
 0x168   : > { %v631_v31 = vadd.f32 %v585_v45, %v524_v25  ;;  %v2786_v45 = vrot.slane %v199_v21, %v1179_v19 }
 0x169   : > { %v731_v46 = vpop.f32.mrf.mxu1  ;;  %v587_v47 = vpop.f32.mrf.mxu0 }
 0x16a   : > { %v739_v18 = vadd.f32 %v731_v46, %v632_v12 }
 0x16b   : > { %v2469_v48 = vpop.f32.mrf.mxu1  ;;  %v588_v49 = vpop.f32.mrf.mxu0 }
 0x16c   : > { %v2788_v48 = vrot.slane %v199_v21, %v1171_v29 }
 0x16d   : > { %v734_v50 = vpop.f32.mrf.mxu1  ;;  %v690_v51 = vpop.f32.mrf.mxu0 }
 0x16e   : > { %v737_v30 = vadd.f32 %v690_v51, %v630_v26 }
 0x16f   : > { %v2470_v52 = vpop.f32.mrf.mxu1  ;;  %v692_v53 = vpop.f32.mrf.mxu0 }
 0x170   : > { %v738_v27 = vadd.f32 %v692_v53, %v631_v31  ;;  %v2790_v53 = vrot.slane %v199_v21, %v1175_v41 }
 0x171   : > { %v838_v54 = vpop.f32.mrf.mxu1  ;;  %v694_v55 = vpop.f32.mrf.mxu0 }
 0x172   : > { %v846_v28 = vadd.f32 %v838_v54, %v739_v18 }
 0x173   : > { %v2475_v56 = vpop.f32.mrf.mxu1  ;;  %v695_v57 = vpop.f32.mrf.mxu0 }
 0x175   : > { %v841_v58 = vpop.f32.mrf.mxu1  ;;  %v797_v59 = vpop.f32.mrf.mxu0 }
 0x176   : > { %v844_v36 = vadd.f32 %v797_v59, %v737_v30 }
 0x177   : > { %v2476_v60 = vpop.f32.mrf.mxu1  ;;  %v799_v61 = vpop.f32.mrf.mxu0 }
 0x178   : > { %v845_v39 = vadd.f32 %v799_v61, %v738_v27 }
 0x179   : > { %v945_v62 = vpop.f32.mrf.mxu1  ;;  %v801_v63 = vpop.f32.mrf.mxu0 }
 0x17a   : > { %v953_v32 = vadd.f32 %v945_v62, %v846_v28 }
 0x17b   : > { %v2481_v2 = vpop.f32.mrf.mxu1  ;;  %v802_v3 = vpop.f32.mrf.mxu0 }
 0x17d   : > { %v948_v5 = vpop.f32.mrf.mxu1  ;;  %v904_v6 = vpop.f32.mrf.mxu0 }
 0x17e   : > { %v951_v40 = vadd.f32 %v904_v6, %v844_v36 }
 0x17f   : > { %v2482_v8 = vpop.f32.mrf.mxu1  ;;  %v906_v9 = vpop.f32.mrf.mxu0 }
 0x180   : > { %v952_v46 = vadd.f32 %v906_v9, %v845_v39 }
 0x181   : > { %v1052_v13 = vpop.f32.mrf.mxu1  ;;  %v908_v14 = vpop.f32.mrf.mxu0 }
 0x182   : > { %v1060_v35 = vadd.f32 %v1052_v13, %v953_v32 }
 0x183   : > { %v2487_v20 = vpop.f32.mrf.mxu1  ;;  %v909_v23 = vpop.f32.mrf.mxu0 }
 0x185   : > { %v1055_v16 = vpop.f32.mrf.mxu1  ;;  %v1011_v22 = vpop.f32.mrf.mxu0 }
 0x186   : > { %v1058_v47 = vadd.f32 %v1011_v22, %v951_v40 }
 0x187   : > { %v2488_v33 = vpop.f32.mrf.mxu1  ;;  %v1013_v34 = vpop.f32.mrf.mxu0 }
 0x188   : > { %v1059_v51 = vadd.f32 %v1013_v34, %v952_v46 }
 0x189   : > { %v1159_v38 = vpop.f32.mrf.mxu1  ;;  %v1015_v37 = vpop.f32.mrf.mxu0 }
 0x18a   : > { %v1167_v42 = vadd.f32 %v1159_v38, %v1060_v35 }
 0x18b   : > { %v1016_v43 = vpop.f32.mrf.mxu0  ;;  %v2493_v44 = vpop.f32.mrf.mxu1 }
 0x18c   : > { %v1186_v56 = vmul.f32 %v2786_v45, %v1167_v42 }
 0x18d   : > { %v1118_v49 = vpop.f32.mrf.mxu0  ;;  %v1162_v50 = vpop.f32.mrf.mxu1 }
 0x18e   : > { %v1165_v52 = vadd.f32 %v1118_v49, %v1058_v47  ;;  %v1195_v62 = vmul.f32 %v1186_v56, %v1167_v42  ;;  %v1189_v4 = vsel %vm1188_vm12, %v1186_v56, 0.0  ;;  %v2358_v49 = vld [vmem:[%s2957_s3 + $0x4] sm:$0xf] }
 0x18f   : > { %v1120_v54 = vpop.f32.mrf.mxu0  ;;  %v2494_v55 = vpop.f32.mrf.mxu1 }
 0x190   : > { %v1184_v57 = vmul.f32 %v2788_v48, %v1165_v52  ;;  %v1166_v58 = vadd.f32 %v1120_v54, %v1059_v51  ;;  %v1197_v7 = vsel %vm1188_vm12, %v1195_v62, 0.0 }
 0x191   : > { %v1122_v59 = vpop.f32.mrf.mxu0 }
 0x192   : > { %v1185_v60 = vmul.f32 %v2790_v53, %v1166_v58  ;;  %v1193_v63 = vmul.f32 %v1184_v57, %v1165_v52 }
 0x193   : > { %v1123_v61 = vpop.f32.mrf.mxu0 }
 0x194   : > { %v1194_v2 = vmul.f32 %v1185_v60, %v1166_v58  ;;  %v1187_v3 = vadd.f32 %v1185_v60, %v1184_v57  ;;  %v1236_v60 = vld [vmem:[%s2957_s3] sm:$0xf] }
 0x196   : > { %v1190_v5 = vadd.f32 %v1189_v4, %v1187_v3  ;;  %v1196_v6 = vadd.f32 %v1194_v2, %v1193_v63 }
 0x198   : > { %1191 = vadd.xlane.f32.xlu1 %v1190_v5  ;;  %v1198_v8 = vadd.f32 %v1197_v7, %v1196_v6 }
 0x19a   : > { %1199 = vadd.xlane.f32.xlu0 %v1198_v8  ;;  %v2369_v8 = vld [vmem:[%s2957_s3 + $0x8] sm:$0xf] }
 0x221   : > { %v1192_v9 = vpop.xlane.xlu1 %1191 }
 0x222   : > { %v1201_v10 = vmul.f32 0.00390625, %v1192_v9 }
 0x223   : > { %v1200_v11 = vpop.xlane.xlu0 %1199 }
 0x224   : > { %v1202_v12 = vmul.f32 0.00390625, %v1200_v11  ;;  %v1203_v13 = vmul.f32 %v1201_v10, %v1201_v10  ;;  %v1206_v18 = vsub.f32 %v1165_v52, %v1201_v10  ;;  %v1207_v20 = vsub.f32 %v1166_v58, %v1201_v10 }
 0x225   : > { %v1208_v23 = vsub.f32 %v1167_v42, %v1201_v10 }
 0x226   : > { %v1204_v14 = vsub.f32 %v1202_v12, %v1203_v13 }
 0x228   : > { %v1205_v15 = vmax.f32 %v1204_v14, 0.0 }
 0x22a   : > { %v1209_v17 = vadd.f32 1e-05, %v1205_v15 }
 0x22c   : > { %2583 = vrsqrt.f32 %v1209_v17 }
 0x239   : > { %v2584_v24 = vpop.eup %2583 }
 0x23a   : > { %v1211_v25 = vmul.f32 %v2584_v24, %v1206_v18  ;;  %v1212_v26 = vmul.f32 %v2584_v24, %v1207_v20  ;;  %v1213_v28 = vmul.f32 %v2584_v24, %v1208_v23  ;;  %v2373_v20 = vld [vmem:[%s2957_s3 + $0xc] sm:$0xf] }
 0x23c   : > { %v1214_v16 = vmul.f32 %v1211_v25, %v2788_v48  ;;  %v1215_v22 = vmul.f32 %v1212_v26, %v2790_v53  ;;  %v1216_v31 = vmul.f32 %v1213_v28, %v2786_v45 }
 0x23e   : > { %v2403_v30 = vpack.c.bf16 %v1215_v22, %v1214_v16  ;;  %v2404_v32 = vpack.c.bf16 %v1216_v31, %v1216_v31  ;;  %v2801_v29 = vpack.c.bf16 %v1214_v16, %v1214_v16  ;;  %v2803_v35 = vpack.c.bf16 %v1215_v22, %v1215_v22 }
 0x240   : > { %1233 = vst [vmem:[#allocation2 + $0x4] sm:$0xff] %v2403_v30  ;;  %1235 = vst.msk [vmem:[#allocation2 + $0xc] sm:$0xf] %vm1234_vm14, %v2404_v32  ;;  %v1697_v25 = vsel %vm226_vm1, %v2801_v29, 0  ;;  %v2377_v30 = vld [vmem:[%s2957_s3 + $0x10] sm:$0xf] }
 0x247   : > { %v1237_v33 = vld [vmem:[#allocation2] sm:$0xff]  ;;  %v1238_v27 = vld [vmem:[#allocation2 + $0x8] sm:$0xff] }
 0x248   : > { %v2360_v34 = vcombine.high %v1237_v33, %v1237_v33  ;;  %v2359_v19 = vcombine.low %v1237_v33, %v1237_v33  ;;  %v2361_v36 = vcombine.low %v1238_v27, %v1238_v27  ;;  %v2362_v21 = vcombine.high %v1238_v27, %v1238_v27  ;;  %v2807_v38 = vld [vmem:[#allocation2 + $0xc] ss:$0 sps:$4 sm:$0xff]  }
 0x249   : > { %v1703_v26 = vsel %vm226_vm1, %v2807_v38, 0 }
 0x24a   : > { %1253 = vrot.lane.b32.xlu1 %v2360_v34, %s2609_s29  ;;  %1251 = vrot.lane.b32.xlu0 %v2359_v19, %s2609_s29 }
 0x24e   : > { %1255 = vrot.lane.b32.xlu1 %v2361_v36, %s2609_s29  ;;  %1257 = vrot.lane.b32.xlu0 %v2362_v21, %s2609_s29 }
 0x252   : > { %1356 = vrot.lane.b32.xlu1 %v2359_v19, %s2610_s30  ;;  %1358 = vrot.lane.b32.xlu0 %v2360_v34, %s2610_s30 }
 0x256   : > { %1360 = vrot.lane.b32.xlu1 %v2361_v36, %s2610_s30  ;;  %1362 = vrot.lane.b32.xlu0 %v2362_v21, %s2610_s30 }
 0x25a   : > { %1463 = vrot.lane.b32.xlu1 %v2359_v19, %s2611_s5  ;;  %1465 = vrot.lane.b32.xlu0 %v2360_v34, %s2611_s5 }
 0x25e   : > { %1467 = vrot.lane.b32.xlu1 %v2361_v36, %s2611_s5  ;;  %1469 = vrot.lane.b32.xlu0 %v2362_v21, %s2611_s5  ;;  %s197_s5 = scalar_lea.vmem %s2958_s4, %s2549_s28 }
 0x262   : > { %1573 = vrot.lane.b32.xlu1 %v2359_v19, %s2612_s6  ;;  %1575 = vrot.lane.b32.xlu0 %v2360_v34, %s2612_s6 }
 0x266   : > { %1577 = vrot.lane.b32.xlu1 %v2361_v36, %s2612_s6  ;;  %1579 = vrot.lane.b32.xlu0 %v2362_v21, %s2612_s6 }
 0x26a   : > { %1791 = vrot.lane.b32.xlu1 %v2801_v29, %s2613_s7  ;;  %1793 = vrot.lane.b32.xlu0 %v2803_v35, %s2613_s7 }
 0x26e   : > { %1795 = vrot.lane.b32.xlu1 %v2807_v38, %s2613_s7  ;;  %1898 = vrot.lane.b32.xlu0 %v2801_v29, %s2601_s22 }
 0x272   : > { %1900 = vrot.lane.b32.xlu1 %v2803_v35, %s2601_s22  ;;  %1902 = vrot.lane.b32.xlu0 %v2807_v38, %s2601_s22 }
 0x276   : > { %2004 = vrot.lane.b32.xlu1 %v2801_v29, %s2600_s21  ;;  %2006 = vrot.lane.b32.xlu0 %v2803_v35, %s2600_s21 }
 0x27a   : > { %2008 = vrot.lane.b32.xlu1 %v2807_v38, %s2600_s21  ;;  %2110 = vrot.lane.b32.xlu0 %v2801_v29, %s2602_s23 }
 0x27e   : > { %2112 = vrot.lane.b32.xlu1 %v2803_v35, %s2602_s23  ;;  %2114 = vrot.lane.b32.xlu0 %v2807_v38, %s2602_s23 }
 0x2bc   : > { %v1254_v37 = vpop.permute.xlu1 %1253  ;;  %v1252_v39 = vpop.permute.xlu0 %1251 }
 0x2bd   : > { %v1260_v40 = vsel %vm1259_vm15, %v1252_v39, %v1254_v37 }
 0x2be   : > { %v1267_v46 = vsel %vm226_vm1, %v1260_v40, 0 }
 0x2c0   : > { %v1256_v41 = vpop.permute.xlu1 %1255  ;;  %v1258_v42 = vpop.permute.xlu0 %1257 }
 0x2c1   : > { %v1261_v43 = vsel %vm1259_vm15, %v1254_v37, %v1256_v41  ;;  %v1262_v44 = vsel %vm1259_vm15, %v1256_v41, %v1258_v42 }
 0x2c2   : > { %v1273_v47 = vsel %vm226_vm1, %v1262_v44, 0  ;;  %2363 = vmatprep.subr.msk.bf16.mxu0 %vm226_vm1, %v1261_v43  ;;  %v2388_v43 = vld [vmem:[%s2957_s3 + $0x18] sm:$0xf] }
 0x2c3   : > { %1290 = vmatpush1.bf16.msra.mxu0 %v1267_v46  ;;  %2496 = vmatpush3.bf16.msra.mxu1 %v1273_v47 }
 0x2c4   : > { %v1357_v50 = vpop.permute.xlu1 %1356  ;;  %v1359_v51 = vpop.permute.xlu0 %1358  ;;  %2501 = vmatprep.subr.bf16.mxu1 %v2597_v0 }
 0x2c5   : > { %v1365_v52 = vsel %vm1364_vm6, %v1357_v50, %v1359_v51 }
 0x2c6   : > { %2364 = vmatmul.mubr.msk.bf16.vlgmr.msra.gmra.mxu0 %vm222_vm2, %v2358_v49  ;;  %2498 = vmatmul.mubr.msk.bf16.vlgmr.msra.gmra.mxu1 %vm222_vm2, %v2358_v49  ;;  %v1372_v58 = vsel %vm226_vm1, %v1365_v52, 0  ;;  %v2392_v52 = vld [vmem:[%s2957_s3 + $0x1c] sm:$0xf] }
 0x2c7   : > { %1412 = vmatprep.mubr.bf16.mxu0 %v2599_v1  ;;  %2503 = vmatprep.mubr.msk.bf16.mxu1 %vm2598_vm0, %v2597_v0 }
 0x2c8   : > { %v1361_v54 = vpop.permute.xlu1 %1360  ;;  %v1363_v55 = vpop.permute.xlu0 %1362 }
 0x2c9   : > { %v1366_v56 = vsel %vm1364_vm6, %v1359_v51, %v1361_v54  ;;  %v1367_v57 = vsel %vm1364_vm6, %v1361_v54, %v1363_v55 }
 0x2ca   : > { %v1378_v59 = vsel %vm226_vm1, %v1367_v57, 0  ;;  %2366 = vmatprep.subr.msk.bf16.mxu0 %vm226_vm1, %v1366_v56  ;;  %v2396_v56 = vld [vmem:[%s2957_s3 + $0x20] sm:$0xf] }
 0x2cb   : > { %1395 = vmatpush1.bf16.msra.mxu0 %v1372_v58  ;;  %2502 = vmatpush3.bf16.msra.mxu1 %v1378_v59 }
 0x2cc   : > { %v1464_v61 = vpop.permute.xlu1 %1463  ;;  %v1466_v62 = vpop.permute.xlu0 %1465  ;;  %2507 = vmatprep.subr.bf16.mxu1 %v2597_v0 }
 0x2cd   : > { %v1472_v63 = vsel %vm1471_vm7, %v1464_v61, %v1466_v62 }
 0x2ce   : > { %2367 = vmatmul.mubr.msk.bf16.vlgmr.msra.gmra.mxu0 %vm222_vm2, %v1236_v60  ;;  %2504 = vmatmul.mubr.msk.bf16.vlgmr.msra.gmra.mxu1 %vm222_vm2, %v1236_v60  ;;  %v1479_v6 = vsel %vm226_vm1, %v1472_v63, 0 }
 0x2cf   : > { %1519 = vmatprep.mubr.bf16.mxu0 %v2599_v1  ;;  %2509 = vmatprep.mubr.msk.bf16.mxu1 %vm2598_vm0, %v2597_v0 }
 0x2d0   : > { %v1468_v2 = vpop.permute.xlu1 %1467  ;;  %v1470_v3 = vpop.permute.xlu0 %1469 }
 0x2d1   : > { %v1473_v4 = vsel %vm1471_vm7, %v1466_v62, %v1468_v2  ;;  %v1474_v5 = vsel %vm1471_vm7, %v1468_v2, %v1470_v3 }
 0x2d2   : > { %v1485_v7 = vsel %vm226_vm1, %v1474_v5, 0  ;;  %2370 = vmatprep.subr.msk.bf16.mxu0 %vm226_vm1, %v1473_v4 }
 0x2d3   : > { %1502 = vmatpush1.bf16.msra.mxu0 %v1479_v6  ;;  %2508 = vmatpush3.bf16.msra.mxu1 %v1485_v7 }
 0x2d4   : > { %v1574_v9 = vpop.permute.xlu1 %1573  ;;  %v1576_v10 = vpop.permute.xlu0 %1575  ;;  %2513 = vmatprep.subr.bf16.mxu1 %v2597_v0 }
 0x2d5   : > { %v1582_v11 = vsel %vm1581_vm8, %v1574_v9, %v1576_v10 }
 0x2d6   : > { %2371 = vmatmul.mubr.msk.bf16.vlgmr.msra.gmra.mxu0 %vm222_vm2, %v2369_v8  ;;  %2510 = vmatmul.mubr.msk.bf16.vlgmr.msra.gmra.mxu1 %vm222_vm2, %v2369_v8  ;;  %v1589_v17 = vsel %vm226_vm1, %v1582_v11, 0 }
 0x2d7   : > { %1629 = vmatprep.mubr.bf16.mxu0 %v2599_v1  ;;  %2515 = vmatprep.mubr.msk.bf16.mxu1 %vm2598_vm0, %v2597_v0 }
 0x2d8   : > { %v1578_v12 = vpop.permute.xlu1 %1577  ;;  %v1580_v13 = vpop.permute.xlu0 %1579 }
 0x2d9   : > { %v1583_v14 = vsel %vm1581_vm8, %v1576_v10, %v1578_v12  ;;  %v1584_v15 = vsel %vm1581_vm8, %v1578_v12, %v1580_v13 }
 0x2da   : > { %v1595_v18 = vsel %vm226_vm1, %v1584_v15, 0  ;;  %2374 = vmatprep.subr.msk.bf16.mxu0 %vm226_vm1, %v1583_v14 }
 0x2db   : > { %1612 = vmatpush1.bf16.msra.mxu0 %v1589_v17  ;;  %2514 = vmatpush3.bf16.msra.mxu1 %v1595_v18 }
 0x2dc   : > { %v1792_v23 = vpop.permute.xlu1 %1791  ;;  %2381 = vmatprep.subr.msk.bf16.mxu0 %vm226_vm1, %v2803_v35  ;;  %v1794_v24 = vpop.permute.xlu0 %1793  ;;  %2519 = vmatprep.subr.bf16.mxu1 %v2597_v0  ;;  %v2384_v35 = vld [vmem:[%s2957_s3 + $0x14] sm:$0xf] }
 0x2dd   : > { %v1798_v31 = vsel %vm1797_vm9, %v1792_v23, %v1794_v24 }
 0x2de   : > { %2375 = vmatmul.mubr.msk.bf16.vlgmr.msra.gmra.mxu0 %vm222_vm2, %v2373_v20  ;;  %2516 = vmatmul.mubr.msk.bf16.vlgmr.msra.gmra.mxu1 %vm222_vm2, %v2373_v20  ;;  %v1804_v19 = vsel %vm226_vm1, %v1798_v31, 0 }
 0x2df   : > { %1720 = vmatpush1.bf16.msra.mxu0 %v1697_v25  ;;  %2520 = vmatpush3.bf16.msra.mxu1 %v1703_v26 }
 0x2e0   : > { %v1796_v28 = vpop.permute.xlu1 %1795  ;;  %v1899_v16 = vpop.permute.xlu0 %1898  ;;  %1737 = vmatprep.mubr.bf16.mxu0 %v2599_v1  ;;  %2521 = vmatprep.mubr.msk.bf16.mxu1 %vm2598_vm0, %v2597_v0 }
 0x2e1   : > { %v1799_v22 = vsel %vm1797_vm9, %v1794_v24, %v1796_v28  ;;  %2525 = vmatprep.subr.bf16.mxu1 %v2597_v0  ;;  %v1810_v27 = vsel %vm226_vm1, %v1796_v28, 0 }
 0x2e2   : > { %2385 = vmatprep.subr.msk.bf16.mxu0 %vm226_vm1, %v1799_v22 }
 0x2e4   : > { %v1901_v32 = vpop.permute.xlu1 %1900  ;;  %v1903_v33 = vpop.permute.xlu0 %1902 }
 0x2e5   : > { %v1905_v34 = vsel %vm323_vm4, %v1901_v32, %v1903_v33  ;;  %v1904_v29 = vsel %vm323_vm4, %v1899_v16, %v1901_v32  ;;  %v1916_v40 = vsel %vm226_vm1, %v1903_v33, 0 }
 0x2e6   : > { %2382 = vmatmul.mubr.msk.bf16.vlgmr.msra.gmra.mxu0 %vm222_vm2, %v2377_v30  ;;  %2522 = vmatmul.mubr.msk.bf16.vlgmr.msra.gmra.mxu1 %vm222_vm2, %v2377_v30  ;;  %v1910_v39 = vsel %vm226_vm1, %v1904_v29, 0 }
 0x2e7   : > { %1827 = vmatpush1.bf16.msra.mxu0 %v1804_v19  ;;  %2526 = vmatpush3.bf16.msra.mxu1 %v1810_v27 }
 0x2e8   : > { %2389 = vmatprep.subr.msk.bf16.mxu0 %vm226_vm1, %v1905_v34  ;;  %v2005_v36 = vpop.permute.xlu1 %2004  ;;  %v2007_v21 = vpop.permute.xlu0 %2006  ;;  %1844 = vmatprep.mubr.bf16.mxu0 %v2599_v1 }
 0x2e9   : > { %2527 = vmatprep.mubr.msk.bf16.mxu1 %vm2598_vm0, %v2597_v0  ;;  %2531 = vmatprep.subr.bf16.mxu1 %v2597_v0  ;;  %v2010_v42 = vsel %vm219_vm3, %v2005_v36, %v2007_v21 }
 0x2ea   : > { %v2016_v47 = vsel %vm226_vm1, %v2010_v42, 0 }
 0x2ec   : > { %v2009_v38 = vpop.permute.xlu1 %2008  ;;  %v2111_v41 = vpop.permute.xlu0 %2110 }
 0x2ed   : > { %v2011_v37 = vsel %vm219_vm3, %v2007_v21, %v2009_v38  ;;  %v2022_v49 = vsel %vm226_vm1, %v2009_v38, 0 }
 0x2ee   : > { %2386 = vmatmul.mubr.msk.bf16.vlgmr.msra.gmra.mxu0 %vm222_vm2, %v2384_v35  ;;  %2528 = vmatmul.mubr.msk.bf16.vlgmr.msra.gmra.mxu1 %vm222_vm2, %v2384_v35 }
 0x2ef   : > { %1933 = vmatpush1.bf16.msra.mxu0 %v1910_v39  ;;  %2532 = vmatpush3.bf16.msra.mxu1 %v1916_v40 }
 0x2f0   : > { %2393 = vmatprep.subr.msk.bf16.mxu0 %vm226_vm1, %v2011_v37  ;;  %1950 = vmatprep.mubr.bf16.mxu0 %v2599_v1  ;;  %v2113_v44 = vpop.permute.xlu1 %2112  ;;  %v2115_v46 = vpop.permute.xlu0 %2114 }
 0x2f1   : > { %2533 = vmatprep.mubr.msk.bf16.mxu1 %vm2598_vm0, %v2597_v0  ;;  %2537 = vmatprep.subr.bf16.mxu1 %v2597_v0  ;;  %v2117_v50 = vsel %vm427_vm5, %v2113_v44, %v2115_v46  ;;  %v2116_v51 = vsel %vm427_vm5, %v2111_v41, %v2113_v44  ;;  %v2128_v55 = vsel %vm226_vm1, %v2115_v46, 0 }
 0x2f2   : > { %v2122_v54 = vsel %vm226_vm1, %v2116_v51, 0 }
 0x2f6   : > { %2390 = vmatmul.mubr.msk.bf16.vlgmr.msra.gmra.mxu0 %vm222_vm2, %v2388_v43  ;;  %2534 = vmatmul.mubr.msk.bf16.vlgmr.msra.gmra.mxu1 %vm222_vm2, %v2388_v43 }
 0x2f7   : > { %2039 = vmatpush1.bf16.msra.mxu0 %v2016_v47  ;;  %2538 = vmatpush3.bf16.msra.mxu1 %v2022_v49 }
 0x2f8   : > { %2397 = vmatprep.subr.msk.bf16.mxu0 %vm226_vm1, %v2117_v50  ;;  %2056 = vmatprep.mubr.bf16.mxu0 %v2599_v1 }
 0x2f9   : > { %2539 = vmatprep.mubr.msk.bf16.mxu1 %vm2598_vm0, %v2597_v0  ;;  %2543 = vmatprep.subr.bf16.mxu1 %v2597_v0 }
 0x2fe   : > { %2394 = vmatmul.mubr.msk.bf16.vlgmr.msra.gmra.mxu0 %vm222_vm2, %v2392_v52  ;;  %2540 = vmatmul.mubr.msk.bf16.vlgmr.msra.gmra.mxu1 %vm222_vm2, %v2392_v52 }
 0x2ff   : > { %2145 = vmatpush1.bf16.msra.mxu0 %v2122_v54  ;;  %2544 = vmatpush3.bf16.msra.mxu1 %v2128_v55 }
 0x300   : > { %2162 = vmatprep.mubr.bf16.mxu0 %v2599_v1  ;;  %2545 = vmatprep.mubr.msk.bf16.mxu1 %vm2598_vm0, %v2597_v0 }
 0x306   : > { %2398 = vmatmul.mubr.msk.bf16.vlgmr.msra.gmra.mxu0 %vm222_vm2, %v2396_v56  ;;  %2546 = vmatmul.mubr.msk.bf16.vlgmr.msra.gmra.mxu1 %vm222_vm2, %v2396_v56 }
 0x386   : > { %v1309_v57 = vpop.f32.mrf.mxu0  ;;  %v1350_v58 = vpop.f32.mrf.mxu1 }
 0x388   : > { %v1311_v59 = vpop.f32.mrf.mxu0  ;;  %v2499_v60 = vpop.f32.mrf.mxu1 }
 0x38a   : > { %v1313_v61 = vpop.f32.mrf.mxu0  ;;  %v1353_v62 = vpop.f32.mrf.mxu1 }
 0x38c   : > { %v1314_v63 = vpop.f32.mrf.mxu0  ;;  %v2500_v2 = vpop.f32.mrf.mxu1 }
 0x38e   : > { %v1414_v1 = vpop.f32.mrf.mxu0  ;;  %v1455_v3 = vpop.f32.mrf.mxu1 }
 0x38f   : > { %v1415_v46 = vadd.f32 %v1414_v1, %v1309_v57  ;;  %v1456_v47 = vadd.f32 %v1455_v3, %v1350_v58 }
 0x390   : > { %v1416_v4 = vpop.f32.mrf.mxu0  ;;  %v2505_v0 = vpop.f32.mrf.mxu1 }
 0x391   : > { %v1417_v51 = vadd.f32 %v1416_v4, %v1311_v59 }
 0x392   : > { %v1418_v5 = vpop.f32.mrf.mxu0  ;;  %v1458_v6 = vpop.f32.mrf.mxu1 }
 0x394   : > { %v1419_v7 = vpop.f32.mrf.mxu0  ;;  %v2506_v8 = vpop.f32.mrf.mxu1 }
 0x396   : > { %v1521_v9 = vpop.f32.mrf.mxu0  ;;  %v1562_v10 = vpop.f32.mrf.mxu1 }
 0x397   : > { %v1568_v52 = vadd.f32 %v1521_v9, %v1415_v46  ;;  %v1570_v54 = vadd.f32 %v1562_v10, %v1456_v47 }
 0x398   : > { %v1523_v11 = vpop.f32.mrf.mxu0  ;;  %v2511_v12 = vpop.f32.mrf.mxu1 }
 0x399   : > { %v1569_v60 = vadd.f32 %v1523_v11, %v1417_v51 }
 0x39a   : > { %v1525_v13 = vpop.f32.mrf.mxu0  ;;  %v1565_v14 = vpop.f32.mrf.mxu1 }
 0x39c   : > { %v1526_v15 = vpop.f32.mrf.mxu0  ;;  %v2512_v17 = vpop.f32.mrf.mxu1 }
 0x39e   : > { %v1631_v18 = vpop.f32.mrf.mxu0  ;;  %v1672_v20 = vpop.f32.mrf.mxu1 }
 0x39f   : > { %v1678_v61 = vadd.f32 %v1631_v18, %v1568_v52  ;;  %v1680_v62 = vadd.f32 %v1672_v20, %v1570_v54 }
 0x3a0   : > { %v1633_v23 = vpop.f32.mrf.mxu0  ;;  %v2517_v24 = vpop.f32.mrf.mxu1 }
 0x3a1   : > { %v1679_v0 = vadd.f32 %v1633_v23, %v1569_v60 }
 0x3a2   : > { %v1635_v25 = vpop.f32.mrf.mxu0  ;;  %v1675_v26 = vpop.f32.mrf.mxu1 }
 0x3a4   : > { %v1636_v28 = vpop.f32.mrf.mxu0  ;;  %v2518_v16 = vpop.f32.mrf.mxu1 }
 0x3a6   : > { %v1739_v22 = vpop.f32.mrf.mxu0  ;;  %v1780_v31 = vpop.f32.mrf.mxu1 }
 0x3a7   : > { %v1786_v5 = vadd.f32 %v1739_v22, %v1678_v61  ;;  %v1788_v6 = vadd.f32 %v1780_v31, %v1680_v62 }
 0x3a8   : > { %v1741_v30 = vpop.f32.mrf.mxu0  ;;  %v2523_v32 = vpop.f32.mrf.mxu1 }
 0x3a9   : > { %v1787_v12 = vadd.f32 %v1741_v30, %v1679_v0 }
 0x3aa   : > { %v1743_v33 = vpop.f32.mrf.mxu0  ;;  %v1783_v34 = vpop.f32.mrf.mxu1 }
 0x3ac   : > { %v1744_v19 = vpop.f32.mrf.mxu0  ;;  %v2524_v27 = vpop.f32.mrf.mxu1 }
 0x3ae   : > { %v1846_v36 = vpop.f32.mrf.mxu0  ;;  %v1887_v21 = vpop.f32.mrf.mxu1 }
 0x3af   : > { %v1893_v57 = vadd.f32 %v1846_v36, %v1786_v5  ;;  %v1895_v58 = vadd.f32 %v1887_v21, %v1788_v6 }
 0x3b0   : > { %v1848_v29 = vpop.f32.mrf.mxu0  ;;  %v2529_v35 = vpop.f32.mrf.mxu1 }
 0x3b1   : > { %v1894_v59 = vadd.f32 %v1848_v29, %v1787_v12 }
 0x3b2   : > { %v1850_v38 = vpop.f32.mrf.mxu0  ;;  %v1890_v37 = vpop.f32.mrf.mxu1 }
 0x3b4   : > { %v1851_v39 = vpop.f32.mrf.mxu0  ;;  %v2530_v40 = vpop.f32.mrf.mxu1 }
 0x3b6   : > { %v1952_v41 = vpop.f32.mrf.mxu0  ;;  %v1993_v42 = vpop.f32.mrf.mxu1 }
 0x3b7   : > { %v1999_v4 = vadd.f32 %v1952_v41, %v1893_v57  ;;  %v2001_v9 = vadd.f32 %v1993_v42, %v1895_v58 }
 0x3b8   : > { %v1954_v43 = vpop.f32.mrf.mxu0  ;;  %v2535_v44 = vpop.f32.mrf.mxu1 }
 0x3b9   : > { %v2000_v11 = vadd.f32 %v1954_v43, %v1894_v59 }
 0x3ba   : > { %v1956_v49 = vpop.f32.mrf.mxu0  ;;  %v1996_v50 = vpop.f32.mrf.mxu1 }
 0x3bc   : > { %v1957_v55 = vpop.f32.mrf.mxu0  ;;  %v2536_v56 = vpop.f32.mrf.mxu1 }
 0x3be   : > { %v2058_v63 = vpop.f32.mrf.mxu0  ;;  %v2099_v2 = vpop.f32.mrf.mxu1 }
 0x3bf   : > { %v2105_v14 = vadd.f32 %v2058_v63, %v1999_v4  ;;  %v2107_v15 = vadd.f32 %v2099_v2, %v2001_v9 }
 0x3c0   : > { %v2060_v7 = vpop.f32.mrf.mxu0  ;;  %v2541_v8 = vpop.f32.mrf.mxu1 }
 0x3c1   : > { %v2106_v20 = vadd.f32 %v2060_v7, %v2000_v11 }
 0x3c2   : > { %v2062_v1 = vpop.f32.mrf.mxu0  ;;  %v2102_v3 = vpop.f32.mrf.mxu1 }
 0x3c4   : > { %v2063_v10 = vpop.f32.mrf.mxu0  ;;  %v2542_v13 = vpop.f32.mrf.mxu1 }
 0x3c6   : > { %v2164_v17 = vpop.f32.mrf.mxu0  ;;  %v2205_v18 = vpop.f32.mrf.mxu1 }
 0x3c7   : > { %v2211_v23 = vadd.f32 %v2164_v17, %v2105_v14  ;;  %v2213_v24 = vadd.f32 %v2205_v18, %v2107_v15 }
 0x3c8   : > { %v2166_v25 = vpop.f32.mrf.mxu0  ;;  %v2547_v26 = vpop.f32.mrf.mxu1 }
 0x3c9   : > { %v2214_v28 = vmul.f32 %v2211_v23, %v2788_v48  ;;  %v2212_v16 = vadd.f32 %v2166_v25, %v2106_v20  ;;  %v2216_v22 = vmul.f32 %v2213_v24, %v2786_v45 }
 0x3ca   : > { %v2168_v31 = vpop.f32.mrf.mxu0  ;;  %v2208_v30 = vpop.f32.mrf.mxu1 }
 0x3cb   : > { %v2215_v32 = vmul.f32 %v2212_v16, %v2790_v53  ;;  %v2224_v19 = vmul.f32 %v2216_v22, %v2213_v24  ;;  %v2222_v27 = vmul.f32 %v2214_v28, %v2211_v23  ;;  %v2218_v29 = vsel %vm1188_vm12, %v2216_v22, 0.0 }
 0x3cc   : > { %v2169_v33 = vpop.f32.mrf.mxu0  ;;  %v2548_v34 = vpop.f32.mrf.mxu1 }
 0x3cd   : > { %v2223_v36 = vmul.f32 %v2215_v32, %v2212_v16  ;;  %v2217_v21 = vadd.f32 %v2215_v32, %v2214_v28  ;;  %v2226_v37 = vsel %vm1188_vm12, %v2224_v19, 0.0 }
 0x3cf   : > { %v2219_v35 = vadd.f32 %v2218_v29, %v2217_v21  ;;  %v2225_v38 = vadd.f32 %v2223_v36, %v2222_v27 }
 0x3d1   : > { %2220 = vadd.xlane.f32.xlu1 %v2219_v35  ;;  %v2227_v48 = vadd.f32 %v2226_v37, %v2225_v38 }
 0x3d3   : > { %2228 = vadd.xlane.f32.xlu0 %v2227_v48 }
 0x45a   : > { %v2221_v45 = vpop.xlane.xlu1 %2220 }
 0x45b   : > { %v2230_v39 = vmul.f32 0.00390625, %v2221_v45 }
 0x45c   : > { %v2229_v40 = vpop.xlane.xlu0 %2228 }
 0x45d   : > { %v2231_v53 = vmul.f32 0.00390625, %v2229_v40  ;;  %v2232_v41 = vmul.f32 %v2230_v39, %v2230_v39  ;;  %v2235_v46 = vsub.f32 %v2211_v23, %v2230_v39  ;;  %v2236_v47 = vsub.f32 %v2212_v16, %v2230_v39 }
 0x45e   : > { %v2237_v49 = vsub.f32 %v2213_v24, %v2230_v39 }
 0x45f   : > { %v2233_v42 = vsub.f32 %v2231_v53, %v2232_v41 }
 0x461   : > { %v2234_v43 = vmax.f32 %v2233_v42, 0.0 }
 0x463   : > { %v2238_v44 = vadd.f32 1e-05, %v2234_v43 }
 0x465   : > { %2585 = vrsqrt.f32 %v2238_v44 }
 0x472   : > { %v2586_v50 = vpop.eup %2585 }
 0x473   : > { %v2240_v51 = vmul.f32 %v2586_v50, %v2235_v46  ;;  %v2241_v52 = vmul.f32 %v2586_v50, %v2236_v47  ;;  %v2242_v54 = vmul.f32 %v2586_v50, %v2237_v49 }
 0x475   : > { %vm2243_vm0 = vcmp.gt.f32.partialorder %v2240_v51, 0.0  ;;  %vm2244_vm1 = vcmp.gt.f32.partialorder %v2241_v52, 0.0  ;;  %vm2245_vm2 = vcmp.gt.f32.partialorder %v2242_v54, 0.0  ;;  %v2246_v55 = vmul.f32 0.1, %v2240_v51 }
 0x476   : > { %v2247_v56 = vmul.f32 0.1, %v2241_v52  ;;  %v2248_v60 = vmul.f32 0.1, %v2242_v54 }
 0x477   : > { %v2249_v61 = vsel %vm2243_vm0, %v2240_v51, %v2246_v55 }
 0x478   : > { %v2250_v62 = vsel %vm2244_vm1, %v2241_v52, %v2247_v56  ;;  %v2251_v63 = vsel %vm2245_vm2, %v2242_v54, %v2248_v60  ;;  %2252 = vst [vmem:[%s197_s5] sm:$0xff] %v2249_v61 }
 0x479   : > { %2253 = vst [vmem:[%s197_s5 + $0x8] sm:$0xff] %v2250_v62  ;;  %2254 = vst.msk [vmem:[%s197_s5 + $0x10] sm:$0xff] %vm1188_vm12, %v2251_v63 }
 0x47a PF: > { %s14_s15 = sadd.s32 1, %s2595_s15  }
 0x47b   : > { %p11_p4 = scmp.ge.s32.totalorder %s14_s15, 4  }
 0x47d   :  { %13 = sbr.rel (!%p11_p4) target bundleno = 1 (0x1), region = 82 }

</bundles_post_ra>
